<compile_context>
chip_gen: v7x
topology: tpu7x:2x2x1
jax: 0.10.0
libtpu: 0.0.40
codegen_flags: <defaults>
</compile_context>

<pallas_src>
import functools
import math

import jax
import jax.numpy as jnp
from jax.experimental import pallas as pl
from jax.experimental.pallas import tpu as pltpu

_VMEM_LIMIT_BYTES = 64 * 1024 * 1024  # fits every generation (v7x has 64 MiB VMEM)


def _compiler_params():
    return pltpu.CompilerParams(
        dimension_semantics=("parallel", "arbitrary"),
        vmem_limit_bytes=_VMEM_LIMIT_BYTES,
    )


# --------------------------- in-kernel helpers ---------------------------

def _layernorm(x, g, b, eps):
    mu = jnp.mean(x, axis=-1, keepdims=True)
    var = jnp.mean(jnp.square(x - mu), axis=-1, keepdims=True)
    return (x - mu) * jax.lax.rsqrt(var + eps) * g + b


def _gelu_tanh(x):
    # CogVideoXBlock passes activation_fn='gelu-approximate' (tanh GELU).
    # TODO(synk): the standalone FeedForward helper in the spec uses exact-erf
    #             nn.GELU(); swap to 0.5*x*(1+erf(x/sqrt(2))) if exact GELU is needed.
    c = math.sqrt(2.0 / math.pi)
    return 0.5 * x * (1.0 + jnp.tanh(c * (x + 0.044715 * x * x * x)))


# ------------------------------- kernels ---------------------------------

def _attn_block_kernel(hid_ref, enc_ref, ln_g_ref, ln_b_ref, mod_ref,
                       wq_ref, wk_ref, wv_ref,
                       qg_ref, qb_ref, kg_ref, kb_ref,
                       wo_ref, bo_ref,
                       hid_out_ref, enc_out_ref,
                       x_scr, acc_scr,
                       *, text_len, head_dim, ln_eps, qk_eps):
    """norm1 (AdaLN-zero) + attention + gated residual.  grid = (batch, head)."""
    h = pl.program_id(1)

    # First head step: LayerNorm + modulation for both streams, staged as a bf16
    # [text ; video] slab in VMEM; zero the out-projection accumulator.
    @pl.when(h == 0)
    def _():
        g, b = ln_g_ref[...], ln_b_ref[...]
        mod = mod_ref[0]                                       # (6, D) f32
        hid = hid_ref[0].astype(jnp.float32)                   # (S_vid, D)
        enc = enc_ref[0].astype(jnp.float32)                   # (S_txt, D)
        nh = _layernorm(hid, g, b, ln_eps) * (1.0 + mod[1:2]) + mod[0:1]
        ne = _layernorm(enc, g, b, ln_eps) * (1.0 + mod[4:5]) + mod[3:4]
        x_scr[:text_len, :] = ne.astype(x_scr.dtype)
        x_scr[text_len:, :] = nh.astype(x_scr.dtype)
        acc_scr[...] = jnp.zeros_like(acc_scr)

    # Per-head attention; BlockSpec delivers this head's weight slices (no lane
    # slicing inside the kernel).  bf16 MXU operands, f32 accumulation.
    x = x_scr[...]                                             # (S, D) bf16
    q = jnp.dot(x, wq_ref[0], preferred_element_type=jnp.float32)   # (S, hd)
    k = jnp.dot(x, wk_ref[0], preferred_element_type=jnp.float32)
    v = jnp.dot(x, wv_ref[0], preferred_element_type=jnp.float32)
    qn = _layernorm(q, qg_ref[...], qb_ref[...], qk_eps)
    kn = _layernorm(k, kg_ref[...], kb_ref[...], qk_eps)

    s = jax.lax.dot_general(                                   # q . k^T, no transpose
        qn.astype(jnp.bfloat16), kn.astype(jnp.bfloat16),
        (((1,), (1,)), ((), ())),
        preferred_element_type=jnp.float32) * (1.0 / math.sqrt(head_dim))
    s = s - jnp.max(s, axis=-1, keepdims=True)
    p = jnp.exp(s)
    p = p * pl.reciprocal(jnp.sum(p, axis=-1, keepdims=True), approx=True)
    o_h = jnp.dot(p.astype(jnp.bfloat16), v.astype(jnp.bfloat16),
                  preferred_element_type=jnp.float32)          # (S, hd)

    # Out-projection partial sum for this head: o_h @ wo[h*hd:(h+1)*hd, :]
    acc_scr[...] += jnp.dot(o_h.astype(jnp.bfloat16), wo_ref[0],
                            preferred_element_type=jnp.float32)

    # Last head: add bias, split [text ; video], gated residual, write outputs.
    @pl.when(h == pl.num_programs(1) - 1)
    def _():
        mod = mod_ref[0]
        o = acc_scr[...] + bo_ref[...]
        hid = hid_ref[0].astype(jnp.float32)
        enc = enc_ref[0].astype(jnp.float32)
        hid_out_ref[0] = (hid + mod[2:3] * o[text_len:]).astype(hid_out_ref.dtype)
        enc_out_ref[0] = (enc + mod[5:6] * o[:text_len]).astype(enc_out_ref.dtype)


def _ff_block_kernel(hid_ref, enc_ref, ln_g_ref, ln_b_ref, mod_ref,
                     ffg_ref, ffb_ref, w1_ref, w2_ref,
                     hid_out_ref, enc_out_ref,
                     x_scr, acc_scr,
                     *, text_len, ln_eps):
    """norm2 (AdaLN-zero) + FeedForward + gated residual.  grid = (batch, ff_k_tile)."""
    j = pl.program_id(1)

    @pl.when(j == 0)
    def _():
        g, b = ln_g_ref[...], ln_b_ref[...]
        ffg, ffb = ffg_ref[...], ffb_ref[...]
        mod = mod_ref[0]
        hid = hid_ref[0].astype(jnp.float32)
        enc = enc_ref[0].astype(jnp.float32)
        nh = _layernorm(hid, g, b, ln_eps) * (1.0 + mod[1:2]) + mod[0:1]
        ne = _layernorm(enc, g, b, ln_eps) * (1.0 + mod[4:5]) + mod[3:4]
        # FeedForward's own LayerNorm fused here (row-wise => per-stream is fine).
        x_scr[:text_len, :] = _layernorm(ne, ffg, ffb, ln_eps).astype(x_scr.dtype)
        x_scr[text_len:, :] = _layernorm(nh, ffg, ffb, ln_eps).astype(x_scr.dtype)
        acc_scr[...] = jnp.zeros_like(acc_scr)

    # K-tile of the FF inner dim:  acc += gelu(x @ W1[:, tile_j]) @ W2[tile_j, :]
    x = x_scr[...]                                             # (S, D) bf16
    hcol = jnp.dot(x, w1_ref[...], preferred_element_type=jnp.float32)
    hcol = _gelu_tanh(hcol)
    acc_scr[...] += jnp.dot(hcol.astype(jnp.bfloat16), w2_ref[...],
                            preferred_element_type=jnp.float32)

    @pl.when(j == pl.num_programs(1) - 1)
    def _():
        mod = mod_ref[0]
        ff = acc_scr[...]
        hid = hid_ref[0].astype(jnp.float32)
        enc = enc_ref[0].astype(jnp.float32)
        hid_out_ref[0] = (hid + mod[2:3] * ff[text_len:]).astype(hid_out_ref.dtype)
        enc_out_ref[0] = (enc + mod[5:6] * ff[:text_len]).astype(enc_out_ref.dtype)


# --------------------------- pallas_call wrappers -------------------------

def _bcast2(n):
    # broadcast parameter stored as (1, n)
    return pl.BlockSpec((1, n), lambda b, i: (0, 0))


def attn_block(hidden, enc, mod1, w, *, num_heads, head_dim, ln_eps=1e-5):
    B, S_vid, D = hidden.shape
    S_txt = enc.shape[1]
    S = S_txt + S_vid
    kernel = functools.partial(_attn_block_kernel, text_len=S_txt,
                               head_dim=head_dim, ln_eps=ln_eps, qk_eps=1e-6)
    out_shape = (jax.ShapeDtypeStruct((B, S_vid, D), hidden.dtype),
                 jax.ShapeDtypeStruct((B, S_txt, D), enc.dtype))
    return pl.pallas_call(
        kernel,
        out_shape=out_shape,
        grid=(B, num_heads),
        in_specs=[
            pl.BlockSpec((1, S_vid, D), lambda b, h: (b, 0, 0)),      # hidden_states
            pl.BlockSpec((1, S_txt, D), lambda b, h: (b, 0, 0)),      # encoder_hidden
            _bcast2(D), _bcast2(D),                                   # norm1 gamma/beta
            pl.BlockSpec((1, 6, D), lambda b, h: (b, 0, 0)),          # AdaLN vectors
            pl.BlockSpec((1, D, head_dim), lambda b, h: (h, 0, 0)),   # wq head slice
            pl.BlockSpec((1, D, head_dim), lambda b, h: (h, 0, 0)),   # wk head slice
            pl.BlockSpec((1, D, head_dim), lambda b, h: (h, 0, 0)),   # wv head slice
            _bcast2(head_dim), _bcast2(head_dim),                     # q-LN gamma/beta
            _bcast2(head_dim), _bcast2(head_dim),                     # k-LN gamma/beta
            pl.BlockSpec((1, head_dim, D), lambda b, h: (h, 0, 0)),   # wo head slice
            _bcast2(D),                                               # out-proj bias
        ],
        out_specs=(pl.BlockSpec((1, S_vid, D), lambda b, h: (b, 0, 0)),
                   pl.BlockSpec((1, S_txt, D), lambda b, h: (b, 0, 0))),
        scratch_shapes=[pltpu.VMEM((S, D), jnp.bfloat16),   # normalized [text;video]
                        pltpu.VMEM((S, D), jnp.float32)],   # out-proj accumulator
        compiler_params=_compiler_params(),
    )(hidden, enc, w["ln1_g"], w["ln1_b"], mod1,
      w["wq_h"], w["wk_h"], w["wv_h"],
      w["q_ln_g"], w["q_ln_b"], w["k_ln_g"], w["k_ln_b"],
      w["wo_h"], w["bo"])


def ff_block(hidden, enc, mod2, w, *, ff_tile, ln_eps=1e-5):
    B, S_vid, D = hidden.shape
    S_txt = enc.shape[1]
    S = S_txt + S_vid
    Dh = w["ff_w1_bf16"].shape[1]
    n_tiles = Dh // ff_tile
    kernel = functools.partial(_ff_block_kernel, text_len=S_txt, ln_eps=ln_eps)
    out_shape = (jax.ShapeDtypeStruct((B, S_vid, D), hidden.dtype),
                 jax.ShapeDtypeStruct((B, S_txt, D), enc.dtype))
    return pl.pallas_call(
        kernel,
        out_shape=out_shape,
        grid=(B, n_tiles),
        in_specs=[
            pl.BlockSpec((1, S_vid, D), lambda b, j: (b, 0, 0)),
            pl.BlockSpec((1, S_txt, D), lambda b, j: (b, 0, 0)),
            _bcast2(D), _bcast2(D),                                   # norm2 gamma/beta
            pl.BlockSpec((1, 6, D), lambda b, j: (b, 0, 0)),          # AdaLN vectors
            _bcast2(D), _bcast2(D),                                   # FF LN gamma/beta
            pl.BlockSpec((D, ff_tile), lambda b, j: (0, j)),          # W1 column tile
            pl.BlockSpec((ff_tile, D), lambda b, j: (j, 0)),          # W2 row tile
        ],
        out_specs=(pl.BlockSpec((1, S_vid, D), lambda b, j: (b, 0, 0)),
                   pl.BlockSpec((1, S_txt, D), lambda b, j: (b, 0, 0))),
        scratch_shapes=[pltpu.VMEM((S, D), jnp.bfloat16),   # FF input slab
                        pltpu.VMEM((S, D), jnp.float32)],   # FF output accumulator
        compiler_params=_compiler_params(),
    )(hidden, enc, w["ln2_g"], w["ln2_b"], mod2,
      w["ff_ln_g"], w["ff_ln_b"], w["ff_w1_bf16"], w["ff_w2_bf16"])


# ------------------------------ full block --------------------------------

def prepare_weights(p, *, num_heads, head_dim):
    """One-time relayout: head-major bf16 weight slabs for the Pallas kernels."""
    D = num_heads * head_dim
    w = dict(p)

    def head_cols(m):   # (D, D) -> (H, D, hd);  [h] == m[:, h*hd:(h+1)*hd]
        return m.reshape(D, num_heads, head_dim).transpose(1, 0, 2)

    def head_rows(m):   # (D, D) -> (H, hd, D);  [h] == m[h*hd:(h+1)*hd, :]
        return m.reshape(num_heads, head_dim, D)

    w["wq_h"] = head_cols(p["wq"]).astype(jnp.bfloat16)
    w["wk_h"] = head_cols(p["wk"]).astype(jnp.bfloat16)
    w["wv_h"] = head_cols(p["wv"]).astype(jnp.bfloat16)
    w["wo_h"] = head_rows(p["wo"]).astype(jnp.bfloat16)
    w["ff_w1_bf16"] = p["ff_w1"].astype(jnp.bfloat16)
    w["ff_w2_bf16"] = p["ff_w2"].astype(jnp.bfloat16)
    return w


def _modulation(temb, w, b, dim):
    # tiny per-batch SiLU + Linear producing the six AdaLN vectors, packed (B, 6, D):
    # rows = [shift, scale, gate, enc_shift, enc_scale, enc_gate]
    mod = jax.nn.silu(temb) @ w + b
    return mod.reshape(temb.shape[0], 6, dim)


def cogvideox_block_forward(hidden, encoder_hidden, temb, p, *, num_heads, head_dim,
                            ff_tile=None):
    D = num_heads * head_dim
    w = prepare_weights(p, num_heads=num_heads, head_dim=head_dim)
    Dh = p["ff_w1"].shape[1]
    if ff_tile is None:
        ff_tile = 256 if (Dh % 256 == 0) else Dh   # K-tile must be a 128-multiple

    # ---- norm1 + attention + gated residual (fused) ----
    mod1 = _modulation(temb, p["ada1_w"], p["ada1_b"], D)
    hidden, encoder_hidden = attn_block(hidden, encoder_hidden, mod1, w,
                                        num_heads=num_heads, head_dim=head_dim)

    # ---- norm2 + feed-forward + gated residual (fused) ----
    mod2 = _modulation(temb, p["ada2_w"], p["ada2_b"], D)
    hidden, encoder_hidden = ff_block(hidden, encoder_hidden, mod2, w,
                                      ff_tile=ff_tile)
    return hidden, encoder_hidden


# ------------------------- parameters & reference --------------------------

def init_params(key, dim, time_embed_dim):
    ks = jax.random.split(key, 11)

    def n(k, shape, s=0.02):
        return (s * jax.random.normal(k, shape)).astype(jnp.float32)

    head_dim_guess = dim  # q/k LN params sized below in main via reshape of dim
    p = {}
    p["ada1_w"] = n(ks[0], (time_embed_dim, 6 * dim))
    p["ada1_b"] = n(ks[1], (6 * dim,), 0.05)
    p["ln1_g"] = jnp.ones((1, dim), jnp.float32)
    p["ln1_b"] = jnp.zeros((1, dim), jnp.float32)
    p["wq"] = n(ks[2], (dim, dim))
    p["wk"] = n(ks[3], (dim, dim))
    p["wv"] = n(ks[4], (dim, dim))
    p["wo"] = n(ks[5], (dim, dim))
    p["bo"] = n(ks[6], (1, dim), 0.05)
    p["ada2_w"] = n(ks[7], (time_embed_dim, 6 * dim))
    p["ada2_b"] = n(ks[8], (6 * dim,), 0.05)
    p["ln2_g"] = jnp.ones((1, dim), jnp.float32)
    p["ln2_b"] = jnp.zeros((1, dim), jnp.float32)
    p["ff_ln_g"] = jnp.ones((1, dim), jnp.float32)
    p["ff_ln_b"] = jnp.zeros((1, dim), jnp.float32)
    p["ff_w1"] = n(ks[9], (dim, 4 * dim))
    p["ff_w2"] = n(ks[10], (4 * dim, dim))
    return p


def reference_forward(hidden, enc, temb, p, *, num_heads, head_dim):
    # pure-JAX (XLA, f32) reference of the same forward pass for validation.
    D = hidden.shape[-1]
    S_txt = enc.shape[1]

    def ln(x, g, b, eps):
        mu = x.mean(-1, keepdims=True)
        var = ((x - mu) ** 2).mean(-1, keepdims=True)
        return (x - mu) / jnp.sqrt(var + eps) * g + b

    def mods(w, b):
        m = jax.nn.silu(temb) @ w + b
        return [v[:, None, :] for v in jnp.split(m, 6, axis=-1)]

    sh1, sc1, g1, esh1, esc1, eg1 = mods(p["ada1_w"], p["ada1_b"])
    nh = ln(hidden, p["ln1_g"][0], p["ln1_b"][0], 1e-5) * (1 + sc1) + sh1
    ne = ln(enc, p["ln1_g"][0], p["ln1_b"][0], 1e-5) * (1 + esc1) + esh1
    x = jnp.concatenate([ne, nh], axis=1)
    B, S, _ = x.shape
    q = (x @ p["wq"]).reshape(B, S, num_heads, head_dim)
    k = (x @ p["wk"]).reshape(B, S, num_heads, head_dim)
    v = (x @ p["wv"]).reshape(B, S, num_heads, head_dim)
    q = ln(q, p["q_ln_g"][0], p["q_ln_b"][0], 1e-6)
    k = ln(k, p["k_ln_g"][0], p["k_ln_b"][0], 1e-6)
    s = jnp.einsum("bqhd,bkhd->bhqk", q, k) / math.sqrt(head_dim)
    a = jax.nn.softmax(s, axis=-1)
    o = jnp.einsum("bhqk,bkhd->bqhd", a, v).reshape(B, S, D)
    o = o @ p["wo"] + p["bo"][0]
    hidden = hidden + g1 * o[:, S_txt:]
    enc = enc + eg1 * o[:, :S_txt]

    sh2, sc2, g2, esh2, esc2, eg2 = mods(p["ada2_w"], p["ada2_b"])
    nh = ln(hidden, p["ln2_g"][0], p["ln2_b"][0], 1e-5) * (1 + sc2) + sh2
    ne = ln(enc, p["ln2_g"][0], p["ln2_b"][0], 1e-5) * (1 + esc2) + esh2
    x = jnp.concatenate([ne, nh], axis=1)
    h = ln(x, p["ff_ln_g"][0], p["ff_ln_b"][0], 1e-5)
    h = _gelu_tanh(h @ p["ff_w1"])
    ff = h @ p["ff_w2"]
    hidden = hidden + g2 * ff[:, S_txt:]
    enc = enc + eg2 * ff[:, :S_txt]
    return hidden, enc


# ----------------------------------- main ----------------------------------

if __name__ == "__main__":
    B = 2
    num_heads, head_dim = 4, 32
    dim = num_heads * head_dim          # 128 (lane-dense outputs)
    time_embed_dim = 64
    S_txt, S_vid = 8, 16

    key = jax.random.PRNGKey(0)
    k1, k2, k3, k4 = jax.random.split(key, 4)
    hidden = jax.random.normal(k1, (B, S_vid, dim), jnp.float32)
    encoder_hidden = jax.random.normal(k2, (B, S_txt, dim), jnp.float32)
    temb = jax.random.normal(k3, (B, time_embed_dim), jnp.float32)

    params = init_params(k4, dim, time_embed_dim)
    params["q_ln_g"] = jnp.ones((1, head_dim), jnp.float32)
    params["q_ln_b"] = jnp.zeros((1, head_dim), jnp.float32)
    params["k_ln_g"] = jnp.ones((1, head_dim), jnp.float32)
    params["k_ln_b"] = jnp.zeros((1, head_dim), jnp.float32)

    out_h, out_e = cogvideox_block_forward(hidden, encoder_hidden, temb, params,
                                           num_heads=num_heads, head_dim=head_dim)
    jax.block_until_ready((out_h, out_e))

    ref_h, ref_e = reference_forward(hidden, encoder_hidden, temb, params,
                                     num_heads=num_heads, head_dim=head_dim)
    assert out_h.shape == (B, S_vid, dim) and out_e.shape == (B, S_txt, dim)
    # Tolerance accounts for bf16 MXU operands (f32 accumulation) vs the f32 reference.
    assert jnp.allclose(out_h, ref_h, atol=1e-2, rtol=1e-2), "hidden_states mismatch"
    assert jnp.allclose(out_e, ref_e, atol=1e-2, rtol=1e-2), "encoder_hidden_states mismatch"

    print("KERNEL_OK")
</pallas_src>

<mosaic_0001>
module attributes {stable_mosaic.version = 11 : i64} {
  func.func @_attn_block_kernel(%arg0: i32, %arg1: i32, %arg2: memref<1x16x128xf32, #tpu.memory_space<vmem>>, %arg3: memref<1x8x128xf32, #tpu.memory_space<vmem>>, %arg4: memref<1x128xf32, #tpu.memory_space<vmem>>, %arg5: memref<1x128xf32, #tpu.memory_space<vmem>>, %arg6: memref<1x6x128xf32, #tpu.memory_space<vmem>>, %arg7: memref<1x128x32xbf16, #tpu.memory_space<vmem>>, %arg8: memref<1x128x32xbf16, #tpu.memory_space<vmem>>, %arg9: memref<1x128x32xbf16, #tpu.memory_space<vmem>>, %arg10: memref<1x32xf32, #tpu.memory_space<vmem>>, %arg11: memref<1x32xf32, #tpu.memory_space<vmem>>, %arg12: memref<1x32xf32, #tpu.memory_space<vmem>>, %arg13: memref<1x32xf32, #tpu.memory_space<vmem>>, %arg14: memref<1x32x128xbf16, #tpu.memory_space<vmem>>, %arg15: memref<1x128xf32, #tpu.memory_space<vmem>>, %arg16: memref<1x16x128xf32, #tpu.memory_space<vmem>>, %arg17: memref<1x8x128xf32, #tpu.memory_space<vmem>>, %arg18: memref<24x128xbf16, #tpu.memory_space<vmem>>, %arg19: memref<24x128xf32, #tpu.memory_space<vmem>>) attributes {dimension_semantics = [#tpu.dimension_semantics<parallel>, #tpu.dimension_semantics<arbitrary>], iteration_bounds = array<i64: 2, 4>, scalar_prefetch = 0 : i64, scratch_operands = 2 : i64, tpu.core_type = #tpu.core_type<tc>, window_params = [{transform_indices = @transform_0, window_bounds = array<i64: 1, 16, 128>}, {transform_indices = @transform_1, window_bounds = array<i64: 1, 8, 128>}, {pipeline_mode = #tpu.pipeline_mode<synchronous>, transform_indices = @transform_2, window_bounds = array<i64: 1, 128>}, {pipeline_mode = #tpu.pipeline_mode<synchronous>, transform_indices = @transform_3, window_bounds = array<i64: 1, 128>}, {transform_indices = @transform_4, window_bounds = array<i64: 1, 6, 128>}, {transform_indices = @transform_5, window_bounds = array<i64: 1, 128, 32>}, {transform_indices = @transform_6, window_bounds = array<i64: 1, 128, 32>}, {transform_indices = @transform_7, window_bounds = array<i64: 1, 128, 32>}, {pipeline_mode = #tpu.pipeline_mode<synchronous>, transform_indices = @transform_8, window_bounds = array<i64: 1, 32>}, {pipeline_mode = #tpu.pipeline_mode<synchronous>, transform_indices = @transform_9, window_bounds = array<i64: 1, 32>}, {pipeline_mode = #tpu.pipeline_mode<synchronous>, transform_indices = @transform_10, window_bounds = array<i64: 1, 32>}, {pipeline_mode = #tpu.pipeline_mode<synchronous>, transform_indices = @transform_11, window_bounds = array<i64: 1, 32>}, {transform_indices = @transform_12, window_bounds = array<i64: 1, 32, 128>}, {pipeline_mode = #tpu.pipeline_mode<synchronous>, transform_indices = @transform_13, window_bounds = array<i64: 1, 128>}, {transform_indices = @transform_14, window_bounds = array<i64: 1, 16, 128>}, {transform_indices = @transform_15, window_bounds = array<i64: 1, 8, 128>}]} {
    %c0_i32 = arith.constant 0 : i32
    %0 = arith.cmpi eq, %arg1, %c0_i32 : i32
    %1 = arith.extui %0 : i1 to i32
    %c0_i32_0 = arith.constant 0 : i32
    %2 = arith.cmpi ne, %1, %c0_i32_0 : i32
    scf.if %2 {
      %c0_45 = arith.constant 0 : index
      %c0_46 = arith.constant 0 : index
      %89 = vector.load %arg4[%c0_45, %c0_46] : memref<1x128xf32, #tpu.memory_space<vmem>>, vector<1x128xf32>
      %c0_47 = arith.constant 0 : index
      %c0_48 = arith.constant 0 : index
      %90 = vector.load %arg5[%c0_47, %c0_48] : memref<1x128xf32, #tpu.memory_space<vmem>>, vector<1x128xf32>
      %c0_49 = arith.constant 0 : index
      %c0_50 = arith.constant 0 : index
      %c0_51 = arith.constant 0 : index
      %91 = vector.load %arg6[%c0_49, %c0_50, %c0_51] : memref<1x6x128xf32, #tpu.memory_space<vmem>>, vector<1x6x128xf32>
      %92 = vector.shape_cast %91 : vector<1x6x128xf32> to vector<6x128xf32>
      %c0_52 = arith.constant 0 : index
      %c0_53 = arith.constant 0 : index
      %c0_54 = arith.constant 0 : index
      %93 = vector.load %arg2[%c0_52, %c0_53, %c0_54] : memref<1x16x128xf32, #tpu.memory_space<vmem>>, vector<1x16x128xf32>
      %94 = vector.shape_cast %93 : vector<1x16x128xf32> to vector<16x128xf32>
      %c0_55 = arith.constant 0 : index
      %c0_56 = arith.constant 0 : index
      %c0_57 = arith.constant 0 : index
      %95 = vector.load %arg3[%c0_55, %c0_56, %c0_57] : memref<1x8x128xf32, #tpu.memory_space<vmem>>, vector<1x8x128xf32>
      %96 = vector.shape_cast %95 : vector<1x8x128xf32> to vector<8x128xf32>
      %cst_58 = arith.constant dense<0.000000e+00> : vector<16xf32>
      %97 = vector.multi_reduction <add>, %94, %cst_58 [1] : vector<16x128xf32> to vector<16xf32>
      %98 = vector.shape_cast %97 : vector<16xf32> to vector<16x1xf32>
      %cst_59 = arith.constant 1.280000e+02 : f32
      %99 = vector.broadcast %cst_59 : f32 to vector<16x1xf32>
      %100 = arith.divf %98, %99 : vector<16x1xf32>
      %101 = vector.broadcast %100 : vector<16x1xf32> to vector<16x128xf32>
      %102 = arith.subf %94, %101 : vector<16x128xf32>
      %103 = arith.mulf %102, %102 : vector<16x128xf32>
      %cst_60 = arith.constant dense<0.000000e+00> : vector<16xf32>
      %104 = vector.multi_reduction <add>, %103, %cst_60 [1] : vector<16x128xf32> to vector<16xf32>
      %105 = vector.shape_cast %104 : vector<16xf32> to vector<16x1xf32>
      %cst_61 = arith.constant 1.280000e+02 : f32
      %106 = vector.broadcast %cst_61 : f32 to vector<16x1xf32>
      %107 = arith.divf %105, %106 : vector<16x1xf32>
      %108 = vector.broadcast %100 : vector<16x1xf32> to vector<16x128xf32>
      %109 = arith.subf %94, %108 : vector<16x128xf32>
      %cst_62 = arith.constant 9.99999974E-6 : f32
      %110 = vector.broadcast %cst_62 : f32 to vector<16x1xf32>
      %111 = arith.addf %107, %110 : vector<16x1xf32>
      %112 = math.rsqrt %111 : vector<16x1xf32>
      %113 = vector.broadcast %112 : vector<16x1xf32> to vector<16x128xf32>
      %114 = arith.mulf %109, %113 : vector<16x128xf32>
      %115 = vector.broadcast %89 : vector<1x128xf32> to vector<16x128xf32>
      %116 = arith.mulf %114, %115 : vector<16x128xf32>
      %117 = vector.broadcast %90 : vector<1x128xf32> to vector<16x128xf32>
      %118 = arith.addf %116, %117 : vector<16x128xf32>
      %119 = vector.extract_strided_slice %92 {offsets = [1, 0], sizes = [1, 128], strides = [1, 1]} : vector<6x128xf32> to vector<1x128xf32>
      %cst_63 = arith.constant 1.000000e+00 : f32
      %120 = vector.broadcast %cst_63 : f32 to vector<1x128xf32>
      %121 = arith.addf %120, %119 : vector<1x128xf32>
      %122 = vector.broadcast %121 : vector<1x128xf32> to vector<16x128xf32>
      %123 = arith.mulf %118, %122 : vector<16x128xf32>
      %124 = vector.extract_strided_slice %92 {offsets = [0, 0], sizes = [1, 128], strides = [1, 1]} : vector<6x128xf32> to vector<1x128xf32>
      %125 = vector.broadcast %124 : vector<1x128xf32> to vector<16x128xf32>
      %126 = arith.addf %123, %125 : vector<16x128xf32>
      %cst_64 = arith.constant dense<0.000000e+00> : vector<8xf32>
      %127 = vector.multi_reduction <add>, %96, %cst_64 [1] : vector<8x128xf32> to vector<8xf32>
      %128 = vector.shape_cast %127 : vector<8xf32> to vector<8x1xf32>
      %cst_65 = arith.constant 1.280000e+02 : f32
      %129 = vector.broadcast %cst_65 : f32 to vector<8x1xf32>
      %130 = arith.divf %128, %129 : vector<8x1xf32>
      %131 = vector.broadcast %130 : vector<8x1xf32> to vector<8x128xf32>
      %132 = arith.subf %96, %131 : vector<8x128xf32>
      %133 = arith.mulf %132, %132 : vector<8x128xf32>
      %cst_66 = arith.constant dense<0.000000e+00> : vector<8xf32>
      %134 = vector.multi_reduction <add>, %133, %cst_66 [1] : vector<8x128xf32> to vector<8xf32>
      %135 = vector.shape_cast %134 : vector<8xf32> to vector<8x1xf32>
      %cst_67 = arith.constant 1.280000e+02 : f32
      %136 = vector.broadcast %cst_67 : f32 to vector<8x1xf32>
      %137 = arith.divf %135, %136 : vector<8x1xf32>
      %138 = vector.broadcast %130 : vector<8x1xf32> to vector<8x128xf32>
      %139 = arith.subf %96, %138 : vector<8x128xf32>
      %cst_68 = arith.constant 9.99999974E-6 : f32
      %140 = vector.broadcast %cst_68 : f32 to vector<8x1xf32>
      %141 = arith.addf %137, %140 : vector<8x1xf32>
      %142 = math.rsqrt %141 : vector<8x1xf32>
      %143 = vector.broadcast %142 : vector<8x1xf32> to vector<8x128xf32>
      %144 = arith.mulf %139, %143 : vector<8x128xf32>
      %145 = vector.broadcast %89 : vector<1x128xf32> to vector<8x128xf32>
      %146 = arith.mulf %144, %145 : vector<8x128xf32>
      %147 = vector.broadcast %90 : vector<1x128xf32> to vector<8x128xf32>
      %148 = arith.addf %146, %147 : vector<8x128xf32>
      %149 = vector.extract_strided_slice %92 {offsets = [4, 0], sizes = [1, 128], strides = [1, 1]} : vector<6x128xf32> to vector<1x128xf32>
      %cst_69 = arith.constant 1.000000e+00 : f32
      %150 = vector.broadcast %cst_69 : f32 to vector<1x128xf32>
      %151 = arith.addf %150, %149 : vector<1x128xf32>
      %152 = vector.broadcast %151 : vector<1x128xf32> to vector<8x128xf32>
      %153 = arith.mulf %148, %152 : vector<8x128xf32>
      %154 = vector.extract_strided_slice %92 {offsets = [3, 0], sizes = [1, 128], strides = [1, 1]} : vector<6x128xf32> to vector<1x128xf32>
      %155 = vector.broadcast %154 : vector<1x128xf32> to vector<8x128xf32>
      %156 = arith.addf %153, %155 : vector<8x128xf32>
      %157 = arith.truncf %156 : vector<8x128xf32> to vector<8x128xbf16>
      %c0_70 = arith.constant 0 : index
      %c0_71 = arith.constant 0 : index
      %158 = vector.load %arg18[%c0_70, %c0_71] : memref<24x128xbf16, #tpu.memory_space<vmem>>, vector<8x128xbf16>
      tpu.vector_store %arg18[%c0_70, %c0_71], %157 {strides = array<i32>} : memref<24x128xbf16, #tpu.memory_space<vmem>>, vector<8x128xbf16>,
      %159 = arith.truncf %126 : vector<16x128xf32> to vector<16x128xbf16>
      %c8 = arith.constant 8 : index
      %c0_72 = arith.constant 0 : index
      %160 = vector.load %arg18[%c8, %c0_72] : memref<24x128xbf16, #tpu.memory_space<vmem>>, vector<16x128xbf16>
      tpu.vector_store %arg18[%c8, %c0_72], %159 {strides = array<i32>} : memref<24x128xbf16, #tpu.memory_space<vmem>>, vector<16x128xbf16>,
      %cst_73 = arith.constant 0.000000e+00 : f32
      %161 = vector.broadcast %cst_73 : f32 to vector<24x128xf32>
      %c0_74 = arith.constant 0 : index
      %c0_75 = arith.constant 0 : index
      %162 = vector.load %arg19[%c0_74, %c0_75] : memref<24x128xf32, #tpu.memory_space<vmem>>, vector<24x128xf32>
      tpu.vector_store %arg19[%c0_74, %c0_75], %161 {strides = array<i32>} : memref<24x128xf32, #tpu.memory_space<vmem>>, vector<24x128xf32>,
    } else {
    }
    %c0 = arith.constant 0 : index
    %c0_1 = arith.constant 0 : index
    %3 = vector.load %arg18[%c0, %c0_1] : memref<24x128xbf16, #tpu.memory_space<vmem>>, vector<24x128xbf16>
    %c0_2 = arith.constant 0 : index
    %c0_3 = arith.constant 0 : index
    %c0_4 = arith.constant 0 : index
    %4 = vector.load %arg7[%c0_2, %c0_3, %c0_4] : memref<1x128x32xbf16, #tpu.memory_space<vmem>>, vector<1x128x32xbf16>
    %5 = vector.shape_cast %4 : vector<1x128x32xbf16> to vector<128x32xbf16>
    %cst = arith.constant dense<0.000000e+00> : vector<24x32xf32>
    %6 = tpu.matmul %3, %5, %cst {dimension_numbers = #tpu.dot_dimension_numbers<[1], [0], [0], [1], [0, 0, 1, 1], [], []>} : vector<24x128xbf16>, vector<128x32xbf16>, vector<24x32xf32> -> vector<24x32xf32>
    %c0_5 = arith.constant 0 : index
    %c0_6 = arith.constant 0 : index
    %c0_7 = arith.constant 0 : index
    %7 = vector.load %arg8[%c0_5, %c0_6, %c0_7] : memref<1x128x32xbf16, #tpu.memory_space<vmem>>, vector<1x128x32xbf16>
    %8 = vector.shape_cast %7 : vector<1x128x32xbf16> to vector<128x32xbf16>
    %cst_8 = arith.constant dense<0.000000e+00> : vector<24x32xf32>
    %9 = tpu.matmul %3, %8, %cst_8 {dimension_numbers = #tpu.dot_dimension_numbers<[1], [0], [0], [1], [0, 0, 1, 1], [], []>} : vector<24x128xbf16>, vector<128x32xbf16>, vector<24x32xf32> -> vector<24x32xf32>
    %c0_9 = arith.constant 0 : index
    %c0_10 = arith.constant 0 : index
    %c0_11 = arith.constant 0 : index
    %10 = vector.load %arg9[%c0_9, %c0_10, %c0_11] : memref<1x128x32xbf16, #tpu.memory_space<vmem>>, vector<1x128x32xbf16>
    %11 = vector.shape_cast %10 : vector<1x128x32xbf16> to vector<128x32xbf16>
    %cst_12 = arith.constant dense<0.000000e+00> : vector<24x32xf32>
    %12 = tpu.matmul %3, %11, %cst_12 {dimension_numbers = #tpu.dot_dimension_numbers<[1], [0], [0], [1], [0, 0, 1, 1], [], []>} : vector<24x128xbf16>, vector<128x32xbf16>, vector<24x32xf32> -> vector<24x32xf32>
    %c0_13 = arith.constant 0 : index
    %c0_14 = arith.constant 0 : index
    %13 = vector.load %arg10[%c0_13, %c0_14] : memref<1x32xf32, #tpu.memory_space<vmem>>, vector<1x32xf32>
    %c0_15 = arith.constant 0 : index
    %c0_16 = arith.constant 0 : index
    %14 = vector.load %arg11[%c0_15, %c0_16] : memref<1x32xf32, #tpu.memory_space<vmem>>, vector<1x32xf32>
    %cst_17 = arith.constant dense<0.000000e+00> : vector<24xf32>
    %15 = vector.multi_reduction <add>, %6, %cst_17 [1] : vector<24x32xf32> to vector<24xf32>
    %16 = vector.shape_cast %15 : vector<24xf32> to vector<24x1xf32>
    %cst_18 = arith.constant 3.200000e+01 : f32
    %17 = vector.broadcast %cst_18 : f32 to vector<24x1xf32>
    %18 = arith.divf %16, %17 : vector<24x1xf32>
    %19 = vector.broadcast %18 : vector<24x1xf32> to vector<24x32xf32>
    %20 = arith.subf %6, %19 : vector<24x32xf32>
    %21 = arith.mulf %20, %20 : vector<24x32xf32>
    %cst_19 = arith.constant dense<0.000000e+00> : vector<24xf32>
    %22 = vector.multi_reduction <add>, %21, %cst_19 [1] : vector<24x32xf32> to vector<24xf32>
    %23 = vector.shape_cast %22 : vector<24xf32> to vector<24x1xf32>
    %cst_20 = arith.constant 3.200000e+01 : f32
    %24 = vector.broadcast %cst_20 : f32 to vector<24x1xf32>
    %25 = arith.divf %23, %24 : vector<24x1xf32>
    %26 = vector.broadcast %18 : vector<24x1xf32> to vector<24x32xf32>
    %27 = arith.subf %6, %26 : vector<24x32xf32>
    %cst_21 = arith.constant 9.99999997E-7 : f32
    %28 = vector.broadcast %cst_21 : f32 to vector<24x1xf32>
    %29 = arith.addf %25, %28 : vector<24x1xf32>
    %30 = math.rsqrt %29 : vector<24x1xf32>
    %31 = vector.broadcast %30 : vector<24x1xf32> to vector<24x32xf32>
    %32 = arith.mulf %27, %31 : vector<24x32xf32>
    %33 = vector.broadcast %13 : vector<1x32xf32> to vector<24x32xf32>
    %34 = arith.mulf %32, %33 : vector<24x32xf32>
    %35 = vector.broadcast %14 : vector<1x32xf32> to vector<24x32xf32>
    %36 = arith.addf %34, %35 : vector<24x32xf32>
    %c0_22 = arith.constant 0 : index
    %c0_23 = arith.constant 0 : index
    %37 = vector.load %arg12[%c0_22, %c0_23] : memref<1x32xf32, #tpu.memory_space<vmem>>, vector<1x32xf32>
    %c0_24 = arith.constant 0 : index
    %c0_25 = arith.constant 0 : index
    %38 = vector.load %arg13[%c0_24, %c0_25] : memref<1x32xf32, #tpu.memory_space<vmem>>, vector<1x32xf32>
    %cst_26 = arith.constant dense<0.000000e+00> : vector<24xf32>
    %39 = vector.multi_reduction <add>, %9, %cst_26 [1] : vector<24x32xf32> to vector<24xf32>
    %40 = vector.shape_cast %39 : vector<24xf32> to vector<24x1xf32>
    %cst_27 = arith.constant 3.200000e+01 : f32
    %41 = vector.broadcast %cst_27 : f32 to vector<24x1xf32>
    %42 = arith.divf %40, %41 : vector<24x1xf32>
    %43 = vector.broadcast %42 : vector<24x1xf32> to vector<24x32xf32>
    %44 = arith.subf %9, %43 : vector<24x32xf32>
    %45 = arith.mulf %44, %44 : vector<24x32xf32>
    %cst_28 = arith.constant dense<0.000000e+00> : vector<24xf32>
    %46 = vector.multi_reduction <add>, %45, %cst_28 [1] : vector<24x32xf32> to vector<24xf32>
    %47 = vector.shape_cast %46 : vector<24xf32> to vector<24x1xf32>
    %cst_29 = arith.constant 3.200000e+01 : f32
    %48 = vector.broadcast %cst_29 : f32 to vector<24x1xf32>
    %49 = arith.divf %47, %48 : vector<24x1xf32>
    %50 = vector.broadcast %42 : vector<24x1xf32> to vector<24x32xf32>
    %51 = arith.subf %9, %50 : vector<24x32xf32>
    %cst_30 = arith.constant 9.99999997E-7 : f32
    %52 = vector.broadcast %cst_30 : f32 to vector<24x1xf32>
    %53 = arith.addf %49, %52 : vector<24x1xf32>
    %54 = math.rsqrt %53 : vector<24x1xf32>
    %55 = vector.broadcast %54 : vector<24x1xf32> to vector<24x32xf32>
    %56 = arith.mulf %51, %55 : vector<24x32xf32>
    %57 = vector.broadcast %37 : vector<1x32xf32> to vector<24x32xf32>
    %58 = arith.mulf %56, %57 : vector<24x32xf32>
    %59 = vector.broadcast %38 : vector<1x32xf32> to vector<24x32xf32>
    %60 = arith.addf %58, %59 : vector<24x32xf32>
    %61 = arith.truncf %36 : vector<24x32xf32> to vector<24x32xbf16>
    %62 = arith.truncf %60 : vector<24x32xf32> to vector<24x32xbf16>
    %cst_31 = arith.constant dense<0.000000e+00> : vector<24x24xf32>
    %63 = tpu.matmul %61, %62, %cst_31 {dimension_numbers = #tpu.dot_dimension_numbers<[1], [1], [0], [0], [0, 0, 1, 0], [], []>} : vector<24x32xbf16>, vector<24x32xbf16>, vector<24x24xf32> -> vector<24x24xf32>
    %cst_32 = arith.constant 0.176776692 : f32
    %64 = vector.broadcast %cst_32 : f32 to vector<24x24xf32>
    %65 = arith.mulf %63, %64 : vector<24x24xf32>
    %cst_33 = arith.constant dense<0xFF800000> : vector<24xf32>
    %66 = vector.multi_reduction <maximumf>, %65, %cst_33 [1] : vector<24x24xf32> to vector<24xf32>
    %67 = vector.shape_cast %66 : vector<24xf32> to vector<24x1xf32>
    %68 = vector.broadcast %67 : vector<24x1xf32> to vector<24x24xf32>
    %69 = arith.subf %65, %68 : vector<24x24xf32>
    %70 = math.exp %69 : vector<24x24xf32>
    %cst_34 = arith.constant dense<0.000000e+00> : vector<24xf32>
    %71 = vector.multi_reduction <add>, %70, %cst_34 [1] : vector<24x24xf32> to vector<24xf32>
    %72 = vector.shape_cast %71 : vector<24xf32> to vector<24x1xf32>
    %73 = tpu.reciprocal %72 {approx = true} : vector<24x1xf32> -> vector<24x1xf32>
    %74 = vector.broadcast %73 : vector<24x1xf32> to vector<24x24xf32>
    %75 = arith.mulf %70, %74 : vector<24x24xf32>
    %76 = arith.truncf %75 : vector<24x24xf32> to vector<24x24xbf16>
    %77 = arith.truncf %12 : vector<24x32xf32> to vector<24x32xbf16>
    %cst_35 = arith.constant dense<0.000000e+00> : vector<24x32xf32>
    %78 = tpu.matmul %76, %77, %cst_35 {dimension_numbers = #tpu.dot_dimension_numbers<[1], [0], [0], [1], [0, 0, 1, 1], [], []>} : vector<24x24xbf16>, vector<24x32xbf16>, vector<24x32xf32> -> vector<24x32xf32>
    %c0_36 = arith.constant 0 : index
    %c0_37 = arith.constant 0 : index
    %79 = vector.load %arg19[%c0_36, %c0_37] : memref<24x128xf32, #tpu.memory_space<vmem>>, vector<24x128xf32>
    %80 = arith.truncf %78 : vector<24x32xf32> to vector<24x32xbf16>
    %c0_38 = arith.constant 0 : index
    %c0_39 = arith.constant 0 : index
    %c0_40 = arith.constant 0 : index
    %81 = vector.load %arg14[%c0_38, %c0_39, %c0_40] : memref<1x32x128xbf16, #tpu.memory_space<vmem>>, vector<1x32x128xbf16>
    %82 = vector.shape_cast %81 : vector<1x32x128xbf16> to vector<32x128xbf16>
    %cst_41 = arith.constant dense<0.000000e+00> : vector<24x128xf32>
    %83 = tpu.matmul %80, %82, %cst_41 {dimension_numbers = #tpu.dot_dimension_numbers<[1], [0], [0], [1], [0, 0, 1, 1], [], []>} : vector<24x32xbf16>, vector<32x128xbf16>, vector<24x128xf32> -> vector<24x128xf32>
    %84 = arith.addf %79, %83 : vector<24x128xf32>
    %c0_42 = arith.constant 0 : index
    %c0_43 = arith.constant 0 : index
    %85 = vector.load %arg19[%c0_42, %c0_43] : memref<24x128xf32, #tpu.memory_space<vmem>>, vector<24x128xf32>
    tpu.vector_store %arg19[%c0_42, %c0_43], %84 {strides = array<i32>} : memref<24x128xf32, #tpu.memory_space<vmem>>, vector<24x128xf32>,
    %c3_i32 = arith.constant 3 : i32
    %86 = arith.cmpi eq, %arg1, %c3_i32 : i32
    %87 = arith.extui %86 : i1 to i32
    %c0_i32_44 = arith.constant 0 : i32
    %88 = arith.cmpi ne, %87, %c0_i32_44 : i32
    scf.if %88 {
      %c0_45 = arith.constant 0 : index
      %c0_46 = arith.constant 0 : index
      %c0_47 = arith.constant 0 : index
      %89 = vector.load %arg6[%c0_45, %c0_46, %c0_47] : memref<1x6x128xf32, #tpu.memory_space<vmem>>, vector<1x6x128xf32>
      %90 = vector.shape_cast %89 : vector<1x6x128xf32> to vector<6x128xf32>
      %c0_48 = arith.constant 0 : index
      %c0_49 = arith.constant 0 : index
      %91 = vector.load %arg19[%c0_48, %c0_49] : memref<24x128xf32, #tpu.memory_space<vmem>>, vector<24x128xf32>
      %c0_50 = arith.constant 0 : index
      %c0_51 = arith.constant 0 : index
      %92 = vector.load %arg15[%c0_50, %c0_51] : memref<1x128xf32, #tpu.memory_space<vmem>>, vector<1x128xf32>
      %93 = vector.broadcast %92 : vector<1x128xf32> to vector<24x128xf32>
      %94 = arith.addf %91, %93 : vector<24x128xf32>
      %c0_52 = arith.constant 0 : index
      %c0_53 = arith.constant 0 : index
      %c0_54 = arith.constant 0 : index
      %95 = vector.load %arg2[%c0_52, %c0_53, %c0_54] : memref<1x16x128xf32, #tpu.memory_space<vmem>>, vector<1x16x128xf32>
      %96 = vector.shape_cast %95 : vector<1x16x128xf32> to vector<16x128xf32>
      %c0_55 = arith.constant 0 : index
      %c0_56 = arith.constant 0 : index
      %c0_57 = arith.constant 0 : index
      %97 = vector.load %arg3[%c0_55, %c0_56, %c0_57] : memref<1x8x128xf32, #tpu.memory_space<vmem>>, vector<1x8x128xf32>
      %98 = vector.shape_cast %97 : vector<1x8x128xf32> to vector<8x128xf32>
      %99 = vector.extract_strided_slice %90 {offsets = [2, 0], sizes = [1, 128], strides = [1, 1]} : vector<6x128xf32> to vector<1x128xf32>
      %100 = vector.extract_strided_slice %94 {offsets = [8, 0], sizes = [16, 128], strides = [1, 1]} : vector<24x128xf32> to vector<16x128xf32>
      %101 = vector.broadcast %99 : vector<1x128xf32> to vector<16x128xf32>
      %102 = arith.mulf %101, %100 : vector<16x128xf32>
      %103 = arith.addf %96, %102 : vector<16x128xf32>
      %c0_58 = arith.constant 0 : index
      %c0_59 = arith.constant 0 : index
      %c0_60 = arith.constant 0 : index
      %104 = vector.load %arg16[%c0_58, %c0_59, %c0_60] : memref<1x16x128xf32, #tpu.memory_space<vmem>>, vector<1x16x128xf32>
      %105 = vector.shape_cast %104 : vector<1x16x128xf32> to vector<16x128xf32>
      %106 = vector.shape_cast %103 : vector<16x128xf32> to vector<1x16x128xf32>
      tpu.vector_store %arg16[%c0_58, %c0_59, %c0_60], %106 {strides = array<i32>} : memref<1x16x128xf32, #tpu.memory_space<vmem>>, vector<1x16x128xf32>,
      %107 = vector.extract_strided_slice %90 {offsets = [5, 0], sizes = [1, 128], strides = [1, 1]} : vector<6x128xf32> to vector<1x128xf32>
      %108 = vector.extract_strided_slice %94 {offsets = [0, 0], sizes = [8, 128], strides = [1, 1]} : vector<24x128xf32> to vector<8x128xf32>
      %109 = vector.broadcast %107 : vector<1x128xf32> to vector<8x128xf32>
      %110 = arith.mulf %109, %108 : vector<8x128xf32>
      %111 = arith.addf %98, %110 : vector<8x128xf32>
      %c0_61 = arith.constant 0 : index
      %c0_62 = arith.constant 0 : index
      %c0_63 = arith.constant 0 : index
      %112 = vector.load %arg17[%c0_61, %c0_62, %c0_63] : memref<1x8x128xf32, #tpu.memory_space<vmem>>, vector<1x8x128xf32>
      %113 = vector.shape_cast %112 : vector<1x8x128xf32> to vector<8x128xf32>
      %114 = vector.shape_cast %111 : vector<8x128xf32> to vector<1x8x128xf32>
      tpu.vector_store %arg17[%c0_61, %c0_62, %c0_63], %114 {strides = array<i32>} : memref<1x8x128xf32, #tpu.memory_space<vmem>>, vector<1x8x128xf32>,
    } else {
    }
    return
  }
  func.func @transform_0(%arg0: i32, %arg1: i32) -> (i32, i32, i32) {
    %c0_i32 = arith.constant 0 : i32
    %c0_i32_0 = arith.constant 0 : i32
    %c0_i32_1 = arith.constant 0 : i32
    return %arg0, %c0_i32, %c0_i32_0 : i32, i32, i32
  }
  func.func @transform_1(%arg0: i32, %arg1: i32) -> (i32, i32, i32) {
    %c0_i32 = arith.constant 0 : i32
    %c0_i32_0 = arith.constant 0 : i32
    %c0_i32_1 = arith.constant 0 : i32
    return %arg0, %c0_i32, %c0_i32_0 : i32, i32, i32
  }
  func.func @transform_2(%arg0: i32, %arg1: i32) -> (i32, i32) {
    %c0_i32 = arith.constant 0 : i32
    %c0_i32_0 = arith.constant 0 : i32
    %c0_i32_1 = arith.constant 0 : i32
    return %c0_i32, %c0_i32_0 : i32, i32
  }
  func.func @transform_3(%arg0: i32, %arg1: i32) -> (i32, i32) {
    %c0_i32 = arith.constant 0 : i32
    %c0_i32_0 = arith.constant 0 : i32
    %c0_i32_1 = arith.constant 0 : i32
    return %c0_i32, %c0_i32_0 : i32, i32
  }
  func.func @transform_4(%arg0: i32, %arg1: i32) -> (i32, i32, i32) {
    %c0_i32 = arith.constant 0 : i32
    %c0_i32_0 = arith.constant 0 : i32
    %c0_i32_1 = arith.constant 0 : i32
    return %arg0, %c0_i32, %c0_i32_0 : i32, i32, i32
  }
  func.func @transform_5(%arg0: i32, %arg1: i32) -> (i32, i32, i32) {
    %c0_i32 = arith.constant 0 : i32
    %c0_i32_0 = arith.constant 0 : i32
    %c0_i32_1 = arith.constant 0 : i32
    return %arg1, %c0_i32, %c0_i32_0 : i32, i32, i32
  }
  func.func @transform_6(%arg0: i32, %arg1: i32) -> (i32, i32, i32) {
    %c0_i32 = arith.constant 0 : i32
    %c0_i32_0 = arith.constant 0 : i32
    %c0_i32_1 = arith.constant 0 : i32
    return %arg1, %c0_i32, %c0_i32_0 : i32, i32, i32
  }
  func.func @transform_7(%arg0: i32, %arg1: i32) -> (i32, i32, i32) {
    %c0_i32 = arith.constant 0 : i32
    %c0_i32_0 = arith.constant 0 : i32
    %c0_i32_1 = arith.constant 0 : i32
    return %arg1, %c0_i32, %c0_i32_0 : i32, i32, i32
  }
  func.func @transform_8(%arg0: i32, %arg1: i32) -> (i32, i32) {
    %c0_i32 = arith.constant 0 : i32
    %c0_i32_0 = arith.constant 0 : i32
    %c0_i32_1 = arith.constant 0 : i32
    return %c0_i32, %c0_i32_0 : i32, i32
  }
  func.func @transform_9(%arg0: i32, %arg1: i32) -> (i32, i32) {
    %c0_i32 = arith.constant 0 : i32
    %c0_i32_0 = arith.constant 0 : i32
    %c0_i32_1 = arith.constant 0 : i32
    return %c0_i32, %c0_i32_0 : i32, i32
  }
  func.func @transform_10(%arg0: i32, %arg1: i32) -> (i32, i32) {
    %c0_i32 = arith.constant 0 : i32
    %c0_i32_0 = arith.constant 0 : i32
    %c0_i32_1 = arith.constant 0 : i32
    return %c0_i32, %c0_i32_0 : i32, i32
  }
  func.func @transform_11(%arg0: i32, %arg1: i32) -> (i32, i32) {
    %c0_i32 = arith.constant 0 : i32
    %c0_i32_0 = arith.constant 0 : i32
    %c0_i32_1 = arith.constant 0 : i32
    return %c0_i32, %c0_i32_0 : i32, i32
  }
  func.func @transform_12(%arg0: i32, %arg1: i32) -> (i32, i32, i32) {
    %c0_i32 = arith.constant 0 : i32
    %c0_i32_0 = arith.constant 0 : i32
    %c0_i32_1 = arith.constant 0 : i32
    return %arg1, %c0_i32, %c0_i32_0 : i32, i32, i32
  }
  func.func @transform_13(%arg0: i32, %arg1: i32) -> (i32, i32) {
    %c0_i32 = arith.constant 0 : i32
    %c0_i32_0 = arith.constant 0 : i32
    %c0_i32_1 = arith.constant 0 : i32
    return %c0_i32, %c0_i32_0 : i32, i32
  }
  func.func @transform_14(%arg0: i32, %arg1: i32) -> (i32, i32, i32) {
    %c0_i32 = arith.constant 0 : i32
    %c0_i32_0 = arith.constant 0 : i32
    %c0_i32_1 = arith.constant 0 : i32
    return %arg0, %c0_i32, %c0_i32_0 : i32, i32, i32
  }
  func.func @transform_15(%arg0: i32, %arg1: i32) -> (i32, i32, i32) {
    %c0_i32 = arith.constant 0 : i32
    %c0_i32_0 = arith.constant 0 : i32
    %c0_i32_1 = arith.constant 0 : i32
    return %arg0, %c0_i32, %c0_i32_0 : i32, i32, i32
  }
}

</mosaic_0001>

<bundles_post_ra>
// kernel: tpu_custom_call.1
= control target key start
LH: loop header
LB: loop body
LE: loop exit
PB: predicated region body
PF: predicated region fallthrough
CT: control target
= control target key end

     0   :  { %s4088_s0 = inlined_call_operand.hbm [shape: f32[2,16,128], index: 0, kind: input, shape index: {}]   ;;  %s4089_s1 = inlined_call_operand.hbm [shape: f32[2,8,128], index: 1, kind: input, shape index: {}]   ;;  %s4090_s2 = inlined_call_operand.hbm [shape: f32[1,128], index: 2, kind: input, shape index: {}]   ;;  %s4091_s3 = inlined_call_operand.hbm [shape: f32[1,128], index: 3, kind: input, shape index: {}]   ;;  %s4092_s4 = inlined_call_operand.hbm [shape: f32[2,6,128], index: 4, kind: input, shape index: {}]   ;;  %s4093_s5 = inlined_call_operand.hbm [shape: bf16[4,128,32], index: 5, kind: input, shape index: {}]   ;;  %s4094_s6 = inlined_call_operand.hbm [shape: bf16[4,128,32], index: 6, kind: input, shape index: {}]   ;;  %s4095_s7 = inlined_call_operand.hbm [shape: bf16[4,128,32], index: 7, kind: input, shape index: {}]   ;;  %s4096_s8 = inlined_call_operand.hbm [shape: f32[1,32], index: 8, kind: input, shape index: {}]   ;;  %s4097_s9 = inlined_call_operand.hbm [shape: f32[1,32], index: 9, kind: input, shape index: {}]   ;;  %s4098_s10 = inlined_call_operand.hbm [shape: f32[1,32], index: 10, kind: input, shape index: {}]   ;;  %s4099_s11 = inlined_call_operand.hbm [shape: f32[1,32], index: 11, kind: input, shape index: {}]   ;;  %s4100_s12 = inlined_call_operand.hbm [shape: bf16[4,32,128], index: 12, kind: input, shape index: {}]   ;;  %s4101_s13 = inlined_call_operand.hbm [shape: f32[1,128], index: 13, kind: input, shape index: {}]   ;;  %s4102_s14 = inlined_call_operand.hbm [shape: f32[2,16,128], index: 14, kind: output, shape index: {0}]   ;;  %s4103_s15 = inlined_call_operand.hbm [shape: f32[2,8,128], index: 15, kind: output, shape index: {1}]  }
   0x1   :  { %4154 = sst [smem:[#allocation55_spill]] %s4088_s0 }
   0x2   :  { %4155 = sst [smem:[#allocation56_spill]] %s4089_s1 }
   0x3   :  { %4156 = sst [smem:[#allocation57_spill]] %s4090_s2 }
   0x4   :  { %4157 = sst [smem:[#allocation58_spill]] %s4091_s3 }
   0x5   :  { %4158 = sst [smem:[#allocation59_spill]] %s4092_s4 }
   0x6   :  { %4159 = sst [smem:[#allocation60_spill]] %s4093_s5 }
   0x7   :  { %4160 = sst [smem:[#allocation61_spill]] %s4094_s6 }
   0x8   :  { %4161 = sst [smem:[#allocation62_spill]] %s4095_s7 }
   0x9   :  { %4162 = sst [smem:[#allocation63_spill]] %s4096_s8 }
   0xa   :  { %4163 = sst [smem:[#allocation64_spill]] %s4097_s9 }
   0xb   :  { %4164 = sst [smem:[#allocation65_spill]] %s4098_s10 }
   0xc   :  { %4165 = sst [smem:[#allocation66_spill]] %s4099_s11 }
   0xd   :  { %4166 = sst [smem:[#allocation67_spill]] %s4100_s12 }
   0xe   :  { %4167 = sst [smem:[#allocation68_spill]] %s4101_s13 }
   0xf   :  { %4168 = sst [smem:[#allocation69_spill]] %s4102_s14 }
  0x10   :  { %4169 = sst [smem:[#allocation70_spill]] %s4103_s15 }
  0x11   :  { %21 = vsyncpa [#allocation5], 0 }
  0x12   :  { %23 = vsyncpa [#allocation5 + $0x1], 0 }
  0x13   :  { %24 = vsyncpa [#allocation8], 0 }
  0x14   :  { %26 = vsyncpa [#allocation8 + $0x1], 0 }
  0x15   :  { %27 = vsyncpa [#allocation11], 0 }
  0x16   :  { %28 = vsyncpa [#allocation18], 0 }
  0x17   :  { %29 = vsyncpa [#allocation21], 0 }
  0x18   :  { %30 = vsyncpa [#allocation6], 0 }
  0x19   :  { %32 = vsyncpa [#allocation6 + $0x1], 0 }
  0x1a   :  { %33 = vsyncpa [#allocation26], 0 }
  0x1b   :  { %35 = vsyncpa [#allocation26 + $0x1], 0  ;;  %s3258_s18 = smov 0   ;;  %s3260_s19 = smov 0  }
  0x1c   :  { %s3262_s20 = smov 0   ;;  %s3264_s21 = smov 0  }
  0x1d   :  { %s3266_s22 = smov 0   ;;  %s3268_s23 = smov 0  }
  0x1e   :  { %s3270_s24 = smov 0   ;;  %s3272_s25 = smov 0  }
  0x1f   :  { %s3274_s26 = smov 0   ;;  %s3276_s27 = smov 0  }
  0x20   :  { %s3278_s28 = smov 0  }
  0x21 LB: > { %4170 = sst [smem:[#allocation42_spill]] %s3125_s21  ;;  %s3314_s29 = sadd.s32 4294967295, %s3153_s28   ;;  %s3153_s28 = sphi %s3278_s28, %s41_s28   ;;  %s3149_s27 = sphi %s3276_s27, %s4264_s27   ;;  %s3145_s26 = sphi %s3274_s26, %s4269_s26   ;;  %s3141_s25 = sphi %s3272_s25, %s4262_s25   ;;  %s3137_s24 = sphi %s3270_s24, %s4268_s24   ;;  %s3133_s23 = sphi %s3268_s23, %s4261_s23   ;;  %s3129_s22 = sphi %s3266_s22, %s4260_s22   ;;  %s3125_s21 = sphi %s3264_s21, %s4259_s21   ;;  %s3121_s20 = sphi %s3262_s20, %s4267_s20   ;;  %s3117_s19 = sphi %s3260_s19, %s4266_s19   ;;  %s3113_s18 = sphi %s3258_s18, %s4265_s18  }
  0x22   : > { %4171 = sst [smem:[#allocation43_spill]] %s3129_s22  ;;  %p2033_p0 = scmp.ge.s32.totalorder %s3153_s28, 1 }
  0x23   : > { %4172 = sst [smem:[#allocation44_spill]] %s3133_s23  ;;  %p4112_p1 = scmp.eq.s32.totalorder %s3314_s29, 0 }
  0x24   : > { %4173 = sst [smem:[#allocation45_spill]] %s3137_s24  ;;  %p439_p2 = scmp.lt.s32.totalorder %s3153_s28, 9 }
  0x25   : > { %4174 = sst [smem:[#allocation46_spill]] %s3141_s25  ;;  %s3155_s16 = smov [#allocation9]  }
  0x26   : > { %4175 = sst [smem:[#allocation47_spill]] %s3149_s27  ;;  %p3319_p3 = pnand %p2033_p0, %p439_p2 }
  0x27   : > { %s452_s17 = sshll.u32 %s3155_s16, 4  ;;  %s3156_s15 = smov [#allocation23]   ;;  %s453_s17 = int_to_ptr.vmem [resolvable:$true] %s452_s17 }
  0x28   : > { %s4176_s30 = scalar_select %p3319_p3, 1, 0 }
  0x29   : > { %p2318_p4 = pneg %p3319_p3  ;;  %s518_s14 = sshll.u32 %s3156_s15, 4  ;;  %s3331_s14 = int_to_ptr.vmem [resolvable:$true] %s518_s14 }
  0x2a   : > { %4177 = sst [smem:[#allocation48_spill]] %s4176_s30  ;;  %s4179_s2 = sld [smem:[#allocation57_spill]] }
  0x2b   : > { %p3327_p5 = pnand %p2318_p4, %p4112_p1 }
  0x2d   : > { %s4178_s25 = scalar_select %p3327_p5, 1, 0 }
  0x2e   : > { %p3341_p7 = pneg %p3327_p5 }
  0x30   : > { %s2545_s7 = scalar_lea.hbm %s4179_s2, 16 }
  0x31   : > { %p2546_p6 = scmp.ne.s32.totalorder %s4179_s2, %s2545_s7  ;;  %p2552_p10 = scmp.lt.u32.totalorder %s2545_s7, %s4179_s2 }
  0x32   : > { %s4180_s16 = scalar_select %p3341_p7, 1, 0 }
  0x33   : > { %p2548_p8 = pnand %p3341_p7, %p2546_p6 }
  0x35   : > { %p2549_p9 = pneg %p2548_p8 }
  0x37   : > { %p2554_p11 = pnand %p2552_p10, %p2549_p9 }
  0x39   : > { %2557 = shalt.err (!%p2554_p11)
}
  0x3a   : > { %s2558_s12 = scalar_lea.vmem %s453_s17, 16  ;;  %s2565_s10 = scalar_lea.vmem %s453_s17, 32 }
  0x3b   : > { %p2559_p12 = scmp.ne.s32.totalorder %s453_s17, %s2558_s12  ;;  %p2566_p2 = scmp.lt.s32.totalorder %s453_s17, %s453_s17 }
  0x3c   : > { %p2567_p4 = scmp.lt.s32.totalorder %s2565_s10, %s2558_s12 }
  0x3d   : > { %p2561_p13 = pnand %p2559_p12, %p3341_p7 }
  0x3e   : > { %p2568_p1 = por %p2567_p4, %p2566_p2 }
  0x3f   : > { %p2562_p0 = pneg %p2561_p13 }
  0x41   : > { %p2569_p3 = pnand %p2568_p1, %p2562_p0 }
  0x43   : > { %2572 = shalt.err (!%p2569_p3)
}
  0x44   : > { %2321 = dma.hbm_to_vmem [thread:$0]  (!%p3327_p5), %s4179_s2, 16, %s453_s17, [#allocation8]  }
  0x45   : > { %s4181_s13 = sld [smem:[#allocation68_spill]] }
  0x4b   : > { %s2573_s15 = scalar_lea.hbm %s4181_s13, 16 }
  0x4c   : > { %p2574_p6 = scmp.ne.s32.totalorder %s4181_s13, %s2573_s15  ;;  %p2580_p1 = scmp.lt.u32.totalorder %s2573_s15, %s4181_s13 }
  0x4e   : > { %p2576_p8 = pnand %p2574_p6, %p3341_p7 }
  0x50   : > { %p2577_p9 = pneg %p2576_p8 }
  0x52   : > { %p2582_p3 = pnand %p2580_p1, %p2577_p9 }
  0x54   : > { %2585 = shalt.err (!%p2582_p3)
}
  0x55   : > { %s2586_s17 = scalar_lea.vmem %s3331_s14, 16  ;;  %s2593_s6 = scalar_lea.vmem %s3331_s14, 32 }
  0x56   : > { %p2587_p10 = scmp.ne.s32.totalorder %s3331_s14, %s2586_s17  ;;  %p2594_p13 = scmp.lt.s32.totalorder %s3331_s14, %s3331_s14 }
  0x57   : > { %p2595_p0 = scmp.lt.s32.totalorder %s2593_s6, %s2586_s17 }
  0x58   : > { %p2589_p11 = pnand %p2587_p10, %p3341_p7 }
  0x59   : > { %p2596_p2 = por %p2595_p0, %p2594_p13 }
  0x5a   : > { %p2590_p12 = pneg %p2589_p11 }
  0x5c   : > { %p2597_p4 = pnand %p2596_p2, %p2590_p12 }
  0x5e   : > { %2600 = shalt.err (!%p2597_p4)
}
  0x5f   : > { %2339 = dma.hbm_to_vmem [thread:$0]  (!%p3327_p5), %s4181_s13, 16, %s3331_s14, [#allocation8]  }
  0x60   : > { %s2032_s24 = sadd.s32 4294967294, %s3153_s28   ;;  %p67_p6 = scmp.ne.s32.totalorder %s3133_s23, %s3129_s22 }
  0x61   : > { %p4120_p8 = scmp.eq.s32.totalorder %s3153_s28, 0  ;;  %p73_p9 = scmp.ne.s32.totalorder %s3129_s22, %s3125_s21 }
  0x62   : > { %p400_p1 = scmp.eq.s32.totalorder %s3314_s29, 7  ;;  %p406_p3 = scmp.eq.s32.totalorder %s2032_s24, 7 }
  0x63   : > { %p69_p10 = por %p4120_p8, %p67_p6  ;;  %p4182_p11 = scmp.eq.s32.totalorder %s3314_s29, 0 }
  0x64   : > { %p3398_p13 = por %p400_p1, %p67_p6  ;;  %p3402_p0 = por %p406_p3, %p73_p9 }
  0x65   : > { %p3394_p12 = por %p4182_p11, %p73_p9  ;;  %p4119_p2 = scmp.lt.s32.totalorder %s3153_s28, 8 }
  0x66   : > { %s4185_s14 = scalar_select %p3398_p13, 1, 0 }
  0x67   : > { %s4183_s15 = scalar_select %p3394_p12, 1, 0 }
  0x68   : > { %4186 = sst [smem:[#allocation50_spill]] %s4185_s14  ;;  %s4122_s10 = sand.u32 1, %s3153_s28  }
  0x69   : > { %4184 = sst [smem:[#allocation49_spill]] %s4183_s15  ;;  %s4116_s17 = sand.u32 1, %s3133_s23  }
  0x6a   : > { %s4187_s12 = scalar_select %p3402_p0, 1, 0 }
  0x6b   : > { %s2042_s6 = sshll.u32 %s4116_s17, 4  ;;  %s2130_s8 = sshll.u32 %s3149_s27, 8 }
  0x6c   : > { %4188 = sst [smem:[#allocation51_spill]] %s4187_s12  ;;  %s4189_s0 = sld [smem:[#allocation55_spill]] }
  0x6d   : > { %s533_s7 = scalar_lea.vmem [#allocation4], %s2042_s6  ;;  %p3419_p4 = pnand %p4119_p2, %p69_p10 }
  0x6e   : > { %s540_s2 = sshll.u32 %s533_s7, 4  ;;  %s3427_s17 = scalar_lea.sflag [#allocation5], %s4122_s10  ;;  %s3423_s2 = int_to_ptr.vmem [resolvable:$true] %s540_s2 }
  0x6f   : > { %s4190_s13 = scalar_select %p3419_p4, 1, 0 }
  0x70   : > { %p3433_p9 = pneg %p3419_p4 }
  0x72   : > { %s3415_s30 = scalar_lea.hbm %s4189_s0, %s2130_s8  ;;  %s2606_s24 = scalar_lea.hbm %s4189_s0, 512 }
  0x73   : > { %s2601_s11 = scalar_lea.hbm %s3415_s30, 256  ;;  %p2607_p10 = scmp.lt.u32.totalorder %s3415_s30, %s4189_s0 }
  0x74   : > { %p2602_p6 = scmp.ne.s32.totalorder %s3415_s30, %s2601_s11  ;;  %p2608_p11 = scmp.lt.u32.totalorder %s2606_s24, %s2601_s11 }
  0x75   : > { %p2610_p8 = scmp.lt.u32.totalorder %s2601_s11, %s3415_s30 }
  0x76   : > { %p2604_p1 = pnand %p3433_p9, %p2602_p6  ;;  %p2609_p2 = por %p2608_p11, %p2607_p10 }
  0x78   : > { %p2605_p3 = pneg %p2604_p1  ;;  %p2611_p0 = por %p2610_p8, %p2609_p2 }
  0x7a   : > { %p2612_p13 = pnand %p2611_p0, %p2605_p3 }
  0x7c   : > { %2615 = shalt.err (!%p2612_p13)
}
  0x7d   : > { %s2616_s10 = scalar_lea.vmem %s3423_s2, 256  ;;  %s3157_s7 = smov [#allocation4]  }
  0x7e   : > { %p2617_p6 = scmp.ne.s32.totalorder %s3423_s2, %s2616_s10  ;;  %s2621_s6 = sshll.u32 %s3157_s7, 4  ;;  %s2622_s6 = int_to_ptr.vmem [resolvable:$false] %s2621_s6 }
  0x7f   : > { %s2623_s21 = scalar_lea.vmem %s2622_s6, 512  ;;  %p2624_p5 = scmp.lt.s32.totalorder %s3423_s2, %s2622_s6 }
  0x80   : > { %p2619_p1 = pnand %p2617_p6, %p3433_p9  ;;  %p2625_p7 = scmp.lt.s32.totalorder %s2623_s21, %s2616_s10 }
  0x82   : > { %p2620_p12 = pneg %p2619_p1  ;;  %p2626_p10 = por %p2625_p7, %p2624_p5 }
  0x84   : > { %p2627_p11 = pnand %p2626_p10, %p2620_p12 }
  0x86   : > { %2630 = shalt.err (!%p2627_p11)
}
  0x87   : > { %s3158_s12 = smov 128   ;;  %s3159_s11 = smov 8  }
  0x88   : > { %2343 = dma.hbm_to_vmem [thread:$0]  (!%p3419_p4), %s3415_s30, 256, %s3423_s2, %s3427_s17, %s3158_s12, %s3158_s12, %s3159_s11  }
  0x89   : > { %s4192_s24 = sand.u32 1, %s3133_s23   ;;  %s4133_s10 = sshll.u32 %s3149_s27, 7 }
  0x8a   : > { %s3459_s7 = sshll.u32 %s4192_s24, 3  ;;  %s4193_s1 = sld [smem:[#allocation56_spill]] }
  0x8b   : > { %s554_s14 = scalar_lea.vmem [#allocation7], %s3459_s7  ;;  %s4194_s22 = sand.u32 1, %s3153_s28  }
  0x8c   : > { %s561_s15 = sshll.u32 %s554_s14, 4  ;;  %s3472_s2 = scalar_lea.sflag [#allocation8], %s4194_s22  ;;  %s562_s15 = int_to_ptr.vmem [resolvable:$true] %s561_s15 }
  0x90   : > { %s3467_s0 = scalar_lea.hbm %s4193_s1, %s4133_s10  ;;  %s2636_s24 = scalar_lea.hbm %s4193_s1, 256 }
  0x91   : > { %s2631_s30 = scalar_lea.hbm %s3467_s0, 128  ;;  %p2637_p12 = scmp.lt.u32.totalorder %s3467_s0, %s4193_s1 }
  0x92   : > { %p2632_p5 = scmp.ne.s32.totalorder %s3467_s0, %s2631_s30  ;;  %p2638_p13 = scmp.lt.u32.totalorder %s2636_s24, %s2631_s30 }
  0x93   : > { %p2640_p2 = scmp.lt.u32.totalorder %s2631_s30, %s3467_s0 }
  0x94   : > { %p2634_p7 = pnand %p2632_p5, %p3433_p9  ;;  %p2639_p0 = por %p2638_p13, %p2637_p12 }
  0x96   : > { %p2635_p8 = pneg %p2634_p7  ;;  %p2641_p3 = por %p2640_p2, %p2639_p0 }
  0x98   : > { %p2642_p6 = pnand %p2641_p3, %p2635_p8 }
  0x9a   : > { %2645 = shalt.err (!%p2642_p6)
}
  0x9b   : > { %s2646_s22 = scalar_lea.vmem %s562_s15, 128  ;;  %s3160_s14 = smov [#allocation7]  }
  0x9c   : > { %p2647_p1 = scmp.ne.s32.totalorder %s562_s15, %s2646_s22  ;;  %s2651_s10 = sshll.u32 %s3160_s14, 4  ;;  %s2652_s10 = int_to_ptr.vmem [resolvable:$false] %s2651_s10 }
  0x9d   : > { %s2653_s12 = scalar_lea.vmem %s2652_s10, 256  ;;  %p2654_p5 = scmp.lt.s32.totalorder %s562_s15, %s2652_s10 }
  0x9e   : > { %p2649_p10 = pnand %p2647_p1, %p3433_p9  ;;  %p2655_p7 = scmp.lt.s32.totalorder %s2653_s12, %s2646_s22 }
  0xa0   : > { %p2650_p11 = pneg %p2649_p10  ;;  %p2656_p4 = por %p2655_p7, %p2654_p5 }
  0xa2   : > { %p2657_p12 = pnand %p2656_p4, %p2650_p11 }
  0xa4   : > { %2660 = shalt.err (!%p2657_p12)
}
  0xa5   : > { %p4195_p13 = scmp.ne.s32.totalorder %s4190_s13, 0  ;;  %s4196_s30 = sshll.u32 %s3149_s27, 7 }
  0xa6   : > { %s4197_s4 = sld [smem:[#allocation59_spill]]  ;;  %s572_s10 = scalar_lea.vmem [#allocation12], %s3459_s7 }
  0xa7   : > { %2346 = dma.hbm_to_vmem [thread:$0]  (!%p4195_p13), %s3467_s0, 128, %s562_s15, %s3472_s2  }
  0xa8   : > { %s579_s21 = sshll.u32 %s572_s10, 4  ;;  %s580_s21 = int_to_ptr.vmem [resolvable:$true] %s579_s21 }
  0xac   : > { %s3497_s6 = scalar_lea.hbm %s4197_s4, %s4196_s30  ;;  %s2666_s15 = scalar_lea.hbm %s4197_s4, 256 }
  0xad   : > { %s2661_s22 = scalar_lea.hbm %s3497_s6, 128  ;;  %p2667_p2 = scmp.lt.u32.totalorder %s3497_s6, %s4197_s4 }
  0xae   : > { %p2662_p4 = scmp.ne.s32.totalorder %s3497_s6, %s2661_s22  ;;  %p2668_p3 = scmp.lt.u32.totalorder %s2666_s15, %s2661_s22 }
  0xaf   : > { %p2670_p1 = scmp.lt.u32.totalorder %s2661_s22, %s3497_s6 }
  0xb0   : > { %p2664_p8 = pnand %p2662_p4, %p3433_p9  ;;  %p2669_p6 = por %p2668_p3, %p2667_p2 }
  0xb2   : > { %p2665_p0 = pneg %p2664_p8  ;;  %p2671_p10 = por %p2670_p1, %p2669_p6 }
  0xb4   : > { %p2672_p11 = pnand %p2671_p10, %p2665_p0 }
  0xb6   : > { %2675 = shalt.err (!%p2672_p11)
}
  0xb7   : > { %s2676_s7 = scalar_lea.vmem %s580_s21, 128  ;;  %s3161_s30 = smov [#allocation12]  }
  0xb8   : > { %p2677_p5 = scmp.ne.s32.totalorder %s580_s21, %s2676_s7  ;;  %s2681_s24 = sshll.u32 %s3161_s30, 4  ;;  %s2682_s24 = int_to_ptr.vmem [resolvable:$false] %s2681_s24 }
  0xb9   : > { %s2683_s10 = scalar_lea.vmem %s2682_s24, 256  ;;  %p2684_p4 = scmp.lt.s32.totalorder %s580_s21, %s2682_s24 }
  0xba   : > { %p2679_p7 = pnand %p2677_p5, %p3433_p9  ;;  %p2685_p8 = scmp.lt.s32.totalorder %s2683_s10, %s2676_s7 }
  0xbc   : > { %p2680_p12 = pneg %p2679_p7  ;;  %p2686_p13 = por %p2685_p8, %p2684_p4 }
  0xbe   : > { %p2687_p2 = pnand %p2686_p13, %p2680_p12 }
  0xc0   : > { %2690 = shalt.err (!%p2687_p2)
}
  0xc1   : > { %p4198_p3 = scmp.ne.s32.totalorder %s4190_s13, 0  ;;  %s3162_s22 = smov [#allocation10]  }
  0xc2   : > { %s463_s14 = sshll.u32 %s3162_s22, 4  ;;  %s3163_s8 = smov [#allocation17]   ;;  %s464_s14 = int_to_ptr.vmem [resolvable:$true] %s463_s14 }
  0xc3   : > { %2349 = dma.hbm_to_vmem [thread:$0]  (!%p4198_p3), %s3497_s6, 128, %s580_s21, %s3427_s17  }
  0xc4   : > { %s485_s0 = sshll.u32 %s3163_s8, 4  ;;  %s4199_s3 = sld [smem:[#allocation58_spill]]  ;;  %s486_s0 = int_to_ptr.vmem [resolvable:$true] %s485_s0 }
  0xc5   : > { %p4200_p13 = scmp.ne.s32.totalorder %s4180_s16, 0 }
  0xca   : > { %s2691_s11 = scalar_lea.hbm %s4199_s3, 16 }
  0xcb   : > { %p2692_p9 = scmp.ne.s32.totalorder %s4199_s3, %s2691_s11  ;;  %p2698_p1 = scmp.lt.u32.totalorder %s2691_s11, %s4199_s3 }
  0xcd   : > { %p2694_p0 = pnand %p2692_p9, %p4200_p13 }
  0xcf   : > { %p2695_p6 = pneg %p2694_p0 }
  0xd1   : > { %p2700_p10 = pnand %p2698_p1, %p2695_p6 }
  0xd3   : > { %2703 = shalt.err (!%p2700_p10)
}
  0xd4   : > { %s2704_s6 = scalar_lea.vmem %s464_s14, 16  ;;  %s2711_s21 = scalar_lea.vmem %s464_s14, 32 }
  0xd5   : > { %p2705_p11 = scmp.ne.s32.totalorder %s464_s14, %s2704_s6  ;;  %p2712_p12 = scmp.lt.s32.totalorder %s464_s14, %s464_s14 }
  0xd6   : > { %p2713_p4 = scmp.lt.s32.totalorder %s2711_s21, %s2704_s6 }
  0xd7   : > { %p2707_p5 = pnand %p2705_p11, %p4200_p13 }
  0xd8   : > { %p2714_p8 = por %p2713_p4, %p2712_p12 }
  0xd9   : > { %p2708_p7 = pneg %p2707_p5 }
  0xdb   : > { %p2715_p2 = pnand %p2714_p8, %p2708_p7 }
  0xdd   : > { %2718 = shalt.err (!%p2715_p2)
}
  0xde   : > { %p4201_p3 = scmp.ne.s32.totalorder %s4178_s25, 0  ;;  %s4202_s9 = sld [smem:[#allocation64_spill]] }
  0xe0   : > { %2324 = dma.hbm_to_vmem [thread:$0]  (!%p4201_p3), %s4199_s3, 16, %s464_s14, [#allocation11]  }
  0xe4   : > { %s2719_s12 = scalar_lea.hbm %s4202_s9, 16 }
  0xe5   : > { %p2720_p9 = scmp.ne.s32.totalorder %s4202_s9, %s2719_s12  ;;  %p2726_p1 = scmp.lt.u32.totalorder %s2719_s12, %s4202_s9 }
  0xe7   : > { %p2722_p0 = pnand %p2720_p9, %p4200_p13 }
  0xe9   : > { %p2723_p6 = pneg %p2722_p0 }
  0xeb   : > { %p2728_p10 = pnand %p2726_p1, %p2723_p6 }
  0xed   : > { %2731 = shalt.err (!%p2728_p10)
}
  0xee   : > { %s2732_s24 = scalar_lea.vmem %s486_s0, 16  ;;  %s2739_s14 = scalar_lea.vmem %s486_s0, 32 }
  0xef   : > { %p2733_p11 = scmp.ne.s32.totalorder %s486_s0, %s2732_s24  ;;  %p2740_p12 = scmp.lt.s32.totalorder %s486_s0, %s486_s0 }
  0xf0   : > { %p2741_p4 = scmp.lt.s32.totalorder %s2739_s14, %s2732_s24 }
  0xf1   : > { %p2735_p5 = pnand %p2733_p11, %p4200_p13 }
  0xf2   : > { %p2742_p8 = por %p2741_p4, %p2740_p12 }
  0xf3   : > { %p2736_p7 = pneg %p2735_p5 }
  0xf5   : > { %p2743_p2 = pnand %p2742_p8, %p2736_p7 }
  0xf7   : > { %2746 = shalt.err (!%p2743_p2)
}
  0xf8   : > { %2330 = dma.hbm_to_vmem [thread:$0]  (!%p4201_p3), %s4202_s9, 16, %s486_s0, [#allocation18]  }
  0xf9   : > { %s50_s10 = sadd.s32 1, %s3145_s26  ;;  %s180_s22 = sadd.s32 1, %s3121_s20 }
  0xfa   : > { %p51_p9 = scmp.ge.s32.totalorder %s50_s10, 4  ;;  %p187_p0 = scmp.ne.s32.totalorder %s3121_s20, %s3117_s19 }
  0xfb   : > { %p193_p6 = scmp.ne.s32.totalorder %s3117_s19, %s3113_s18  ;;  %s4204_s8 = sadd.s32 1, %s3149_s27 }
  0xfc   : > { %s4271_s10 = smov (%p51_p9, %s50_s10), 0  ;;  %s4273_s8 = smov (!%p51_p9, %s4204_s8), %s3149_s27 }
  0xfd   : > { %4203 = sst [smem:[#allocation52_spill]] %s4271_s10  ;;  %s177_s15 = ssub.s32 %s3145_s26, %s4271_s10 }
  0xfe   : > { %p4205_p1 = scmp.eq.s32.totalorder %s3153_s28, 0  ;;  %p55_p11 = scmp.ge.s32.totalorder %s4273_s8, 2 }
  0xff   : > { %p178_p5 = scmp.eq.s32.totalorder %s177_s15, 0  ;;  %p4207_p7 = scmp.eq.s32.totalorder %s3314_s29, 0 }
 0x100   : > { %p3569_p10 = por %p187_p0, %p4205_p1  ;;  %s4136_s0 = sand.u32 1, %s3121_s20  }
 0x101   : > { %p3575_p12 = por %p193_p6, %p4207_p7  ;;  %s4275_s8 = smov (%p55_p11, %s4273_s8), 0 }
 0x102   : > { %4209 = sst [smem:[#allocation53_spill]] %s4275_s8  ;;  %s57_s30 = ssub.s32 %s3149_s27, %s4275_s8 }
 0x103   : > { %s4208_s18 = scalar_select %p3575_p12, 1, 0 }
 0x104   : > { %s3583_s11 = scalar_select %p178_p5, %s3121_s20, %s180_s22  }
 0x105   : > { %s3589_s7 = sshll.u32 %s4136_s0, 6  ;;  %p58_p4 = scmp.eq.s32.totalorder %s57_s30, 0 }
 0x106   : > { %s3592_s13 = sshll.u32 %s3145_s26, 10  ;;  %s590_s24 = scalar_lea.vmem [#allocation13], %s3589_s7 }
 0x107   : > { %s597_s14 = sshll.u32 %s590_s24, 4  ;;  %s4210_s6 = sadd.s32 1, %s3133_s23  ;;  %s3606_s14 = int_to_ptr.vmem [resolvable:$true] %s597_s14 }
 0x108   : > { %s3598_s21 = scalar_select %p58_p4, %s3133_s23, %s4210_s6  }
 0x109   : > { %s4212_s5 = sld [smem:[#allocation60_spill]]  ;;  %p4213_p8 = scmp.lt.s32.totalorder %s3153_s28, 8 }
 0x10a   : > { %4211 = sst [smem:[#allocation54_spill]] %s3598_s21  ;;  %s4215_s0 = sld [smem:[#allocation61_spill]] }
 0x10b   : > { %p3612_p2 = pnand %p4213_p8, %p3569_p10 }
 0x10d   : > { %s4214_s30 = scalar_select %p3612_p2, 1, 0 }
 0x10e   : > { %p3626_p0 = pneg %p3612_p2 }
 0x10f   : > { %s3604_s22 = scalar_lea.hbm %s4212_s5, %s3592_s13  ;;  %s2752_s9 = scalar_lea.hbm %s4212_s5, 4096 }
 0x110   : > { %s3620_s3 = scalar_lea.hbm %s4215_s0, %s3592_s13  ;;  %s2747_s1 = scalar_lea.hbm %s3604_s22, 1024 }
 0x111   : > { %p2748_p9 = scmp.ne.s32.totalorder %s3604_s22, %s2747_s1  ;;  %p2753_p10 = scmp.lt.u32.totalorder %s3604_s22, %s4212_s5 }
 0x112   : > { %s4216_s15 = scalar_select %p3626_p0, 1, 0 }
 0x113   : > { %p2750_p6 = pnand %p3626_p0, %p2748_p9  ;;  %p2754_p11 = scmp.lt.u32.totalorder %s2752_s9, %s2747_s1 }
 0x114   : > { %p2756_p7 = scmp.lt.u32.totalorder %s2747_s1, %s3604_s22 }
 0x115   : > { %p2751_p1 = pneg %p2750_p6  ;;  %p2755_p5 = por %p2754_p11, %p2753_p10 }
 0x117   : > { %p2757_p4 = por %p2756_p7, %p2755_p5 }
 0x119   : > { %p2758_p8 = pnand %p2757_p4, %p2751_p1 }
 0x11b   : > { %2761 = shalt.err (!%p2758_p8)
}
 0x11c   : > { %s2762_s6 = scalar_lea.vmem %s3606_s14, 1024  ;;  %s3164_s4 = smov [#allocation13]  }
 0x11d   : > { %p2763_p9 = scmp.ne.s32.totalorder %s3606_s14, %s2762_s6  ;;  %s2767_s12 = sshll.u32 %s3164_s4, 4  ;;  %s2768_s12 = int_to_ptr.vmem [resolvable:$false] %s2767_s12 }
 0x11e   : > { %s2769_s8 = scalar_lea.vmem %s2768_s12, 2048  ;;  %p2770_p3 = scmp.lt.s32.totalorder %s3606_s14, %s2768_s12 }
 0x11f   : > { %p2765_p6 = pnand %p2763_p9, %p3626_p0  ;;  %p2771_p13 = scmp.lt.s32.totalorder %s2769_s8, %s2762_s6 }
 0x121   : > { %p2766_p12 = pneg %p2765_p6  ;;  %p2772_p10 = por %p2771_p13, %p2770_p3 }
 0x123   : > { %p2773_p11 = pnand %p2772_p10, %p2766_p12 }
 0x125   : > { %2776 = shalt.err (!%p2773_p11)
}
 0x126   : > { %s4146_s9 = smov 64   ;;  %s4148_s1 = smov 4  }
 0x127   : > { %2352 = dma.hbm_to_vmem [thread:$0]  (!%p3612_p2), %s3604_s22, 1024, %s3606_s14, %s3472_s2, %s4146_s9, %s4146_s9, %s4148_s1  }
 0x128   : > { %s611_s24 = scalar_lea.vmem [#allocation14], %s3589_s7  ;;  %s3167_s4 = smov [#allocation16]  }
 0x129   : > { %s618_s6 = sshll.u32 %s611_s24, 4  ;;  %s3656_s12 = sshll.u32 %s3167_s4, 4  ;;  %s3654_s6 = int_to_ptr.vmem [resolvable:$true] %s618_s6  ;;  %s475_s12 = int_to_ptr.vmem [resolvable:$true] %s3656_s12 }
 0x12a   : > { %s2777_s8 = scalar_lea.hbm %s3620_s3, 1024  ;;  %s2782_s27 = scalar_lea.hbm %s4215_s0, 4096 }
 0x12b   : > { %p2778_p13 = scmp.ne.s32.totalorder %s3620_s3, %s2777_s8  ;;  %p2783_p1 = scmp.lt.u32.totalorder %s3620_s3, %s4215_s0 }
 0x12c   : > { %p2784_p5 = scmp.lt.u32.totalorder %s2782_s27, %s2777_s8  ;;  %p2786_p4 = scmp.lt.u32.totalorder %s2777_s8, %s3620_s3 }
 0x12d   : > { %p2780_p3 = pnand %p2778_p13, %p3626_p0 }
 0x12e   : > { %p2785_p7 = por %p2784_p5, %p2783_p1 }
 0x12f   : > { %p2781_p12 = pneg %p2780_p3 }
 0x130   : > { %p2787_p8 = por %p2786_p4, %p2785_p7 }
 0x132   : > { %p2788_p9 = pnand %p2787_p8, %p2781_p12 }
 0x134   : > { %2791 = shalt.err (!%p2788_p9)
}
 0x135   : > { %s2792_s14 = scalar_lea.vmem %s3654_s6, 1024  ;;  %s3168_s5 = smov [#allocation14]  }
 0x136   : > { %p2793_p6 = scmp.ne.s32.totalorder %s3654_s6, %s2792_s14  ;;  %s2797_s10 = sshll.u32 %s3168_s5, 4  ;;  %s2798_s10 = int_to_ptr.vmem [resolvable:$false] %s2797_s10 }
 0x137   : > { %s2799_s23 = scalar_lea.vmem %s2798_s10, 2048  ;;  %p2800_p13 = scmp.lt.s32.totalorder %s3654_s6, %s2798_s10 }
 0x138   : > { %p2795_p10 = pnand %p2793_p6, %p3626_p0  ;;  %p2801_p3 = scmp.lt.s32.totalorder %s2799_s23, %s2792_s14 }
 0x13a   : > { %p2796_p11 = pneg %p2795_p10  ;;  %p2802_p1 = por %p2801_p3, %p2800_p13 }
 0x13c   : > { %p2803_p5 = pnand %p2802_p1, %p2796_p11 }
 0x13e   : > { %2806 = shalt.err (!%p2803_p5)
}
 0x13f   : > { %2355 = dma.hbm_to_vmem [thread:$0]  (!%p3612_p2), %s3620_s3, 1024, %s3654_s6, %s3427_s17, %s4146_s9, %s4146_s9, %s4148_s1  }
 0x140   : > { %s4217_s22 = sld [smem:[#allocation63_spill]]  ;;  %p4219_p7 = scmp.ne.s32.totalorder %s4180_s16, 0 }
 0x146   : > { %s4218_s4 = smov %s4217_s22  ;;  %s2807_s24 = scalar_lea.hbm %s4217_s22, 16 }
 0x147   : > { %p2808_p12 = scmp.ne.s32.totalorder %s4218_s4, %s2807_s24  ;;  %p2814_p9 = scmp.lt.u32.totalorder %s2807_s24, %s4218_s4 }
 0x149   : > { %p2810_p4 = pnand %p2808_p12, %p4219_p7 }
 0x14b   : > { %p2811_p8 = pneg %p2810_p4 }
 0x14d   : > { %p2816_p6 = pnand %p2814_p9, %p2811_p8 }
 0x14f   : > { %2819 = shalt.err (!%p2816_p6)
}
 0x150   : > { %s2820_s23 = scalar_lea.vmem %s475_s12, 16  ;;  %s2827_s3 = scalar_lea.vmem %s475_s12, 32 }
 0x151   : > { %p2821_p10 = scmp.ne.s32.totalorder %s475_s12, %s2820_s23  ;;  %p2828_p3 = scmp.lt.s32.totalorder %s475_s12, %s475_s12 }
 0x152   : > { %p2829_p1 = scmp.lt.s32.totalorder %s2827_s3, %s2820_s23 }
 0x153   : > { %p2823_p11 = pnand %p2821_p10, %p4219_p7 }
 0x154   : > { %p2830_p5 = por %p2829_p1, %p2828_p3 }
 0x155   : > { %p2824_p13 = pneg %p2823_p11 }
 0x157   : > { %p2831_p2 = pnand %p2830_p5, %p2824_p13 }
 0x159   : > { %2834 = shalt.err (!%p2831_p2)
}
 0x15a   : > { %p4220_p12 = scmp.ne.s32.totalorder %s4178_s25, 0  ;;  %s3169_s21 = smov [#allocation19]  }
 0x15b   : > { %s496_s22 = sshll.u32 %s3169_s21, 4  ;;  %s3170_s24 = smov [#allocation20]   ;;  %s497_s22 = int_to_ptr.vmem [resolvable:$true] %s496_s22 }
 0x15c   : > { %2327 = dma.hbm_to_vmem [thread:$0]  (!%p4220_p12), %s4218_s4, 16, %s475_s12, [#allocation11]  }
 0x15d   : > { %s507_s8 = sshll.u32 %s3170_s24, 4  ;;  %s4221_s10 = sld [smem:[#allocation65_spill]]  ;;  %s508_s8 = int_to_ptr.vmem [resolvable:$true] %s507_s8 }
 0x163   : > { %s2835_s9 = scalar_lea.hbm %s4221_s10, 16 }
 0x164   : > { %p2836_p2 = scmp.ne.s32.totalorder %s4221_s10, %s2835_s9  ;;  %p2842_p9 = scmp.lt.u32.totalorder %s2835_s9, %s4221_s10 }
 0x166   : > { %p2838_p4 = pnand %p2836_p2, %p4219_p7 }
 0x168   : > { %p2839_p8 = pneg %p2838_p4 }
 0x16a   : > { %p2844_p6 = pnand %p2842_p9, %p2839_p8 }
 0x16c   : > { %2847 = shalt.err (!%p2844_p6)
}
 0x16d   : > { %s2848_s12 = scalar_lea.vmem %s497_s22, 16  ;;  %s2855_s27 = scalar_lea.vmem %s497_s22, 32 }
 0x16e   : > { %p2849_p10 = scmp.ne.s32.totalorder %s497_s22, %s2848_s12  ;;  %p2856_p3 = scmp.lt.s32.totalorder %s497_s22, %s497_s22 }
 0x16f   : > { %p2857_p1 = scmp.lt.s32.totalorder %s2855_s27, %s2848_s12 }
 0x170   : > { %p2851_p11 = pnand %p2849_p10, %p4219_p7 }
 0x171   : > { %p2858_p5 = por %p2857_p1, %p2856_p3 }
 0x172   : > { %p2852_p13 = pneg %p2851_p11 }
 0x174   : > { %p2859_p0 = pnand %p2858_p5, %p2852_p13 }
 0x176   : > { %2862 = shalt.err (!%p2859_p0)
}
 0x177   : > { %2333 = dma.hbm_to_vmem [thread:$0]  (!%p4220_p12), %s4221_s10, 16, %s497_s22, [#allocation18]  }
 0x178   : > { %s4222_s14 = sld [smem:[#allocation66_spill]] }
 0x17e   : > { %s2863_s5 = scalar_lea.hbm %s4222_s14, 16 }
 0x17f   : > { %p2864_p2 = scmp.ne.s32.totalorder %s4222_s14, %s2863_s5  ;;  %p2870_p0 = scmp.lt.u32.totalorder %s2863_s5, %s4222_s14 }
 0x181   : > { %p2866_p4 = pnand %p2864_p2, %p4219_p7 }
 0x183   : > { %p2867_p8 = pneg %p2866_p4 }
 0x185   : > { %p2872_p9 = pnand %p2870_p0, %p2867_p8 }
 0x187   : > { %2875 = shalt.err (!%p2872_p9)
}
 0x188   : > { %s2876_s27 = scalar_lea.vmem %s508_s8, 16  ;;  %s2883_s22 = scalar_lea.vmem %s508_s8, 32 }
 0x189   : > { %p2877_p6 = scmp.ne.s32.totalorder %s508_s8, %s2876_s27  ;;  %p2884_p13 = scmp.lt.s32.totalorder %s508_s8, %s508_s8 }
 0x18a   : > { %p2885_p3 = scmp.lt.s32.totalorder %s2883_s22, %s2876_s27 }
 0x18b   : > { %p2879_p10 = pnand %p2877_p6, %p4219_p7 }
 0x18c   : > { %p2886_p1 = por %p2885_p3, %p2884_p13 }
 0x18d   : > { %p2880_p11 = pneg %p2879_p10 }
 0x18f   : > { %p2887_p5 = pnand %p2886_p1, %p2880_p11 }
 0x191   : > { %2890 = shalt.err (!%p2887_p5)
}
 0x192   : > { %2336 = dma.hbm_to_vmem [thread:$0]  (!%p4220_p12), %s4222_s14, 16, %s508_s8, [#allocation21]  }
 0x193   : > { %s4223_s1 = sld [smem:[#allocation62_spill]]  ;;  %s632_s23 = scalar_lea.vmem [#allocation15], %s3589_s7 }
 0x194   : > { %s639_s3 = sshll.u32 %s632_s23, 4  ;;  %s4224_s25 = sand.u32 1, %s3121_s20   ;;  %s3745_s3 = int_to_ptr.vmem [resolvable:$true] %s639_s3 }
 0x195   : > { %s3749_s6 = sshll.u32 %s4224_s25, 4  ;;  %p4225_p2 = scmp.ne.s32.totalorder %s4216_s15, 0 }
 0x199   : > { %s3742_s5 = scalar_lea.hbm %s4223_s1, %s3592_s13  ;;  %s2896_s13 = scalar_lea.hbm %s4223_s1, 4096 }
 0x19a   : > { %s2891_s12 = scalar_lea.hbm %s3742_s5, 1024  ;;  %p2897_p8 = scmp.lt.u32.totalorder %s3742_s5, %s4223_s1 }
 0x19b   : > { %p2892_p7 = scmp.ne.s32.totalorder %s3742_s5, %s2891_s12  ;;  %p2898_p0 = scmp.lt.u32.totalorder %s2896_s13, %s2891_s12 }
 0x19c   : > { %p2900_p6 = scmp.lt.u32.totalorder %s2891_s12, %s3742_s5 }
 0x19d   : > { %p2894_p12 = pnand %p2892_p7, %p4225_p2  ;;  %p2899_p9 = por %p2898_p0, %p2897_p8 }
 0x19f   : > { %p2895_p4 = pneg %p2894_p12  ;;  %p2901_p10 = por %p2900_p6, %p2899_p9 }
 0x1a1   : > { %p2902_p11 = pnand %p2901_p10, %p2895_p4 }
 0x1a3   : > { %2905 = shalt.err (!%p2902_p11)
}
 0x1a4   : > { %s2906_s7 = scalar_lea.vmem %s3745_s3, 1024  ;;  %s3171_s24 = smov [#allocation15]  }
 0x1a5   : > { %p2907_p13 = scmp.ne.s32.totalorder %s3745_s3, %s2906_s7  ;;  %s2911_s9 = sshll.u32 %s3171_s24, 4  ;;  %s2912_s9 = int_to_ptr.vmem [resolvable:$false] %s2911_s9 }
 0x1a6   : > { %s2913_s16 = scalar_lea.vmem %s2912_s9, 2048  ;;  %p2914_p5 = scmp.lt.s32.totalorder %s3745_s3, %s2912_s9 }
 0x1a7   : > { %p2909_p3 = pnand %p2907_p13, %p4225_p2  ;;  %p2915_p7 = scmp.lt.s32.totalorder %s2913_s16, %s2906_s7 }
 0x1a9   : > { %p2910_p1 = pneg %p2909_p3  ;;  %p2916_p12 = por %p2915_p7, %p2914_p5 }
 0x1ab   : > { %p2917_p8 = pnand %p2916_p12, %p2910_p1 }
 0x1ad   : > { %2920 = shalt.err (!%p2917_p8)
}
 0x1ae   : > { %p4226_p4 = scmp.ne.s32.totalorder %s4214_s30, 0  ;;  %s4227_s23 = smov 4  }
 0x1af   : > { %s4228_s25 = smov 64   ;;  %s2134_s12 = sshll.u32 %s3145_s26, 8 }
 0x1b0   : > { %2358 = dma.hbm_to_vmem [thread:$0]  (!%p4226_p4), %s3742_s5, 1024, %s3745_s3, %s3472_s2, %s4228_s25, %s4228_s25, %s4227_s23  }
 0x1b1   : > { %s4229_s13 = sld [smem:[#allocation67_spill]]  ;;  %s653_s21 = scalar_lea.vmem [#allocation22], %s3749_s6 }
 0x1b2   : > { %s660_s7 = sshll.u32 %s653_s21, 4  ;;  %s3783_s7 = int_to_ptr.vmem [resolvable:$true] %s660_s7 }
 0x1b7   : > { %s3780_s22 = scalar_lea.hbm %s4229_s13, %s2134_s12  ;;  %s2926_s3 = scalar_lea.hbm %s4229_s13, 1024 }
 0x1b8   : > { %s2921_s24 = scalar_lea.hbm %s3780_s22, 256  ;;  %p2927_p10 = scmp.lt.u32.totalorder %s3780_s22, %s4229_s13 }
 0x1b9   : > { %p2922_p0 = scmp.ne.s32.totalorder %s3780_s22, %s2921_s24  ;;  %p2928_p11 = scmp.lt.u32.totalorder %s2926_s3, %s2921_s24 }
 0x1ba   : > { %p2930_p3 = scmp.lt.u32.totalorder %s2921_s24, %s3780_s22 }
 0x1bb   : > { %p2924_p9 = pnand %p2922_p0, %p4225_p2  ;;  %p2929_p13 = por %p2928_p11, %p2927_p10 }
 0x1bd   : > { %p2925_p6 = pneg %p2924_p9  ;;  %p2931_p1 = por %p2930_p3, %p2929_p13 }
 0x1bf   : > { %p2932_p5 = pnand %p2931_p1, %p2925_p6 }
 0x1c1   : > { %2935 = shalt.err (!%p2932_p5)
}
 0x1c2   : > { %s2936_s6 = scalar_lea.vmem %s3783_s7, 256  ;;  %s3172_s12 = smov [#allocation22]  }
 0x1c3   : > { %p2937_p7 = scmp.ne.s32.totalorder %s3783_s7, %s2936_s6  ;;  %s2941_s8 = sshll.u32 %s3172_s12, 4  ;;  %s2942_s8 = int_to_ptr.vmem [resolvable:$false] %s2941_s8 }
 0x1c4   : > { %s2943_s27 = scalar_lea.vmem %s2942_s8, 512  ;;  %p2944_p0 = scmp.lt.s32.totalorder %s3783_s7, %s2942_s8 }
 0x1c5   : > { %p2939_p12 = pnand %p2937_p7, %p4225_p2  ;;  %p2945_p9 = scmp.lt.s32.totalorder %s2943_s27, %s2936_s6 }
 0x1c7   : > { %p2940_p8 = pneg %p2939_p12  ;;  %p2946_p10 = por %p2945_p9, %p2944_p0 }
 0x1c9   : > { %p2947_p11 = pnand %p2946_p10, %p2940_p8 }
 0x1cb   : > { %2950 = shalt.err (!%p2947_p11)
}
 0x1cc   : > { %2361 = dma.hbm_to_vmem [thread:$0]  (!%p4226_p4), %s3780_s22, 256, %s3783_s7, %s3427_s17, %s4228_s25, %s4228_s25, %s4227_s23  }
 0x1cd   : > { %s4230_s15 = sld [smem:[#allocation48_spill]] }
 0x1d3   : > { %p4231_p2 = scmp.ne.s32.totalorder %s4230_s15, 0 }
 0x1d4   : > { %s4232_s21 = sld [smem:[#allocation43_spill]] (!%p4231_p2)  ;;  %s4233_s24 = sld [smem:[#allocation49_spill]] (!%p4231_p2) }
 0x1d5   : > { %672 = sbr.rel (%p4231_p2) target bundleno = 2464 (0x9a0), region = 76  ;;  %s674_s2 = sand.u32 (!%p4231_p2), 1, %s3314_s29  }
 0x1d6   : > { %s3817_s30 = scalar_lea.sflag (!%p4231_p2), [#allocation5], %s674_s2 }
 0x1da   : > { %s3814_s5 = sand.u32 (!%p4231_p2), 1, %s4232_s21   ;;  %p4234_p6 = scmp.ne.s32.totalorder (!%p4231_p2), %s4233_s24, 0 }
 0x1db   : > { %s2062_s3 = sshll.u32 (!%p4231_p2), %s3814_s5, 4 }
 0x1dc   : > { %s3821_s9 = scalar_lea.vmem [#allocation4], %s2062_s3 }
 0x1dd   : > { %3052 = dma.done.wait (%p4234_p6), %s3817_s30, 256  }
 0x1de   : > { %3054 = vsyncadd (%p4234_p6), %s3817_s30, 4294967040  ;;  %s3830_s17 = sshll.u32 %s3814_s5, 3  ;;  %s684_s23 = scalar_lea.sflag [#allocation8], %s674_s2 }
 0x1df   : > { %s687_s25 = scalar_lea.vmem [#allocation7], %s3830_s17 }
 0x1e0   : > { %3056 = dma.done.wait (%p4234_p6), %s684_s23, 128  }
 0x1e1   : > { %3058 = vsyncadd (%p4234_p6), %s684_s23, 4294967168  ;;  %p4235_p4 = scmp.eq.s32.totalorder %s3314_s29, 0 }
 0x1e3   : > { %3060 = dma.done.wait (%p4235_p4), [#allocation8], 16   ;;  %p4236_p13 = pmov %p4235_p4 }
 0x1e4   : > { %p4237_p3 = pmov %p4235_p4 }
 0x1e5   : > { %3062 = vsyncadd (%p4236_p13), [#allocation8], 4294967280 }
 0x1e6   : > { %3064 = dma.done.wait (%p4237_p3), [#allocation11], 16   ;;  %p4238_p1 = pmov %p4237_p3 }
 0x1e7   : > { %s704_s22 = scalar_lea.vmem [#allocation12], %s3830_s17 }
 0x1e8   : > { %3066 = vsyncadd (%p4238_p1), [#allocation11], 4294967280 }
 0x1e9   : > { %3068 = dma.done.wait (%p4234_p6), %s3817_s30, 128  }
 0x1ea   : > { %3070 = vsyncadd (%p4234_p6), %s3817_s30, 4294967168  ;;  %s711_s7 = sand.u32 1, %s3117_s19   ;;  %p4239_p5 = scmp.ne.s32.totalorder %s4208_s18, 0 }
 0x1eb   : > { %s2067_s16 = sshll.u32 %s711_s7, 6 }
 0x1ec   : > { %s3853_s6 = scalar_lea.vmem [#allocation13], %s2067_s16 }
 0x1ed   : > { %3072 = dma.done.wait (%p4239_p5), %s684_s23, 1024  }
 0x1ee   : > { %3074 = vsyncadd (%p4239_p5), %s684_s23, 4294966272  ;;  %s3859_s12 = scalar_lea.vmem [#allocation14], %s2067_s16 }
 0x1ef   : > { %3076 = dma.done.wait (%p4239_p5), %s3817_s30, 1024  }
 0x1f0   : > { %3078 = vsyncadd (%p4239_p5), %s3817_s30, 4294966272  ;;  %s3867_s8 = scalar_lea.vmem [#allocation15], %s2067_s16 }
 0x1f1   : > { %3080 = dma.done.wait (%p4239_p5), %s684_s23, 1024  }
 0x1f2   : > { %3082 = vsyncadd (%p4239_p5), %s684_s23, 4294966272  ;;  %p4240_p7 = pmov %p4238_p1 }
 0x1f3   : > { %p4241_p12 = pmov %p4238_p1 }
 0x1f4   : > { %3084 = dma.done.wait (%p4240_p7), [#allocation11], 16  }
 0x1f5   : > { %3086 = vsyncadd (%p4241_p12), [#allocation11], 4294967280  ;;  %p4242_p8 = pmov %p4238_p1 }
 0x1f6   : > { %p4243_p0 = pmov %p4238_p1 }
 0x1f7   : > { %3088 = dma.done.wait (%p4242_p8), [#allocation18], 32  }
 0x1f8   : > { %3090 = vsyncadd (%p4243_p0), [#allocation18], 4294967264  ;;  %p4244_p9 = pmov %p4243_p0 }
 0x1f9   : > { %p4245_p10 = pmov %p4243_p0 }
 0x1fa   : > { %3092 = dma.done.wait (%p4244_p9), [#allocation21], 16  }
 0x1fb   : > { %3094 = vsyncadd (%p4245_p10), [#allocation21], 4294967280  ;;  %s3885_s27 = sshll.u32 %s711_s7, 4 }
 0x1fc   : > { %s756_s15 = scalar_lea.vmem [#allocation22], %s3885_s27 }
 0x1fd   : > { %3096 = dma.done.wait (%p4239_p5), %s3817_s30, 256  }
 0x1fe   : > { %3098 = vsyncadd (%p4239_p5), %s3817_s30, 4294967040  ;;  %p4246_p11 = pmov %p4243_p0 }
 0x1ff   : > { %p4247_p2 = pmov %p4243_p0 }
 0x200   : > { %3100 = dma.done.wait (%p4246_p11), [#allocation8], 16  }
 0x201   : > { %3102 = vsyncadd (%p4247_p2), [#allocation8], 4294967280  ;;  %s3900_s21 = scalar_lea.vmem [#allocation24], %s2062_s3  ;;  %s841_s24 = scalar_lea.vmem [#allocation25], %s3830_s17 }
 0x202   : > { %s4248_s2 = sld [smem:[#allocation45_spill]] }
 0x208   : > { %p2078_p6 = scmp.ne.s32.totalorder %s4248_s2, 0 }
 0x209   : > { %v850_v0 = vld [vmem:[%s3821_s9] sm:$0xff] (!%p2078_p6)  ;;  %v851_v2 = vld [vmem:[%s3821_s9 + $0x8] sm:$0xff] (!%p2078_p6)  ;;  %v3173_v15 = vmov (!%p2078_p6), 0.0   ;;  %v893_v25 = vlaneseq (!%p2078_p6) }
 0x20a   : > { %846 = sbr.rel (%p2078_p6) target bundleno = 845 (0x34d), region = 136  ;;  %v852_v1 = vld [vmem:[%s687_s25] sm:$0xff] (!%p2078_p6)  ;;  %853 = vadd.xlane.f32.xlu0 (!%p2078_p6), %v850_v0  ;;  %940 = vst [vmem:[#allocation3] sm:$0xff] (!%p2078_p6), %v3173_v15  ;;  %941 = vst [vmem:[#allocation3 + $0x8] sm:$0xff] (!%p2078_p6), %v3173_v15  ;;  %v849_v27 = vld [vmem:[%s704_s22] sm:$0x3f] (!%p2078_p6) }
 0x20b   : > { %905 = vadd.xlane.f32.xlu1 (!%p2078_p6), %v852_v1  ;;  %942 = vst [vmem:[#allocation3 + $0x10] sm:$0xff] (!%p2078_p6), %v3173_v15  ;;  %v894_v26 = vshrl.u32 (!%p2078_p6), %v893_v25, 7  ;;  %v2079_v29 = vld [vmem:[#allocation9] ss:$0 sm:$0xff] (!%p2078_p6)  ;;  %v892_v32 = vadd.f32 (!%p2078_p6), 1.0, %v849_v27 }
 0x20c   : > { %v2080_v33 = vld [vmem:[#allocation10] ss:$0 sm:$0xff] (!%p2078_p6) }
 0x20d   : > { %v895_v30 = vsub.s32 (!%p2078_p6), 1, %v894_v26  ;;  %v920_v35 = vsub.s32 (!%p2078_p6), 4, %v894_v26  ;;  %v901_v37 = vsub.s32 (!%p2078_p6), 0, %v894_v26  ;;  %v925_v41 = vsub.s32 (!%p2078_p6), 3, %v894_v26 }
 0x20e   : > { %855 = vadd.xlane.f32.xlu0 (!%p2078_p6), %v851_v2 }
 0x20f   : > { %v896_v40 = vrot.slane (!%p2078_p6), %v892_v32, %v895_v30  ;;  %v921_v45 = vrot.slane (!%p2078_p6), %v892_v32, %v920_v35  ;;  %v902_v48 = vrot.slane (!%p2078_p6), %v849_v27, %v901_v37  ;;  %v926_v50 = vrot.slane (!%p2078_p6), %v849_v27, %v925_v41 }
 0x297   : > { %v854_v3 = vpop.xlane.xlu0 %853 }
 0x298   : > { %v906_v4 = vpop.xlane.xlu1 %905  ;;  %v858_v5 = vmul.f32 0.0078125, %v854_v3 }
 0x299   : > { %v907_v6 = vmul.f32 0.0078125, %v906_v4 }
 0x29a   : > { %v860_v7 = vsub.f32 %v850_v0, %v858_v5 }
 0x29b   : > { %v908_v8 = vsub.f32 %v852_v1, %v907_v6  ;;  %v856_v9 = vpop.xlane.xlu0 %855 }
 0x29c   : > { %v859_v10 = vmul.f32 0.0078125, %v856_v9  ;;  %v862_v11 = vmul.f32 %v860_v7, %v860_v7 }
 0x29d   : > { %v909_v13 = vmul.f32 %v908_v8, %v908_v8 }
 0x29e   : > { %v861_v12 = vsub.f32 %v851_v2, %v859_v10  ;;  %864 = vadd.xlane.f32.xlu1 %v862_v11 }
 0x2a0   : > { %v863_v14 = vmul.f32 %v861_v12, %v861_v12 }
 0x2a2   : > { %910 = vadd.xlane.f32.xlu1 %v909_v13  ;;  %866 = vadd.xlane.f32.xlu0 %v863_v14 }
 0x32b   : > { %v865_v16 = vpop.xlane.xlu1 %864 }
 0x32c   : > { %v868_v17 = vmul.f32 0.0078125, %v865_v16 }
 0x32e   : > { %v870_v18 = vadd.f32 1e-05, %v868_v17 }
 0x32f   : > { %v911_v19 = vpop.xlane.xlu1 %910  ;;  %v867_v20 = vpop.xlane.xlu0 %866 }
 0x330   : > { %2487 = vrsqrt.f32 %v870_v18  ;;  %v912_v21 = vmul.f32 0.0078125, %v911_v19  ;;  %v869_v22 = vmul.f32 0.0078125, %v867_v20 }
 0x332   : > { %v913_v23 = vadd.f32 1e-05, %v912_v21  ;;  %v871_v24 = vadd.f32 1e-05, %v869_v22 }
 0x334   : > { %2489 = vrsqrt.f32 %v913_v23 }
 0x335   : > { %2491 = vrsqrt.f32 %v871_v24 }
 0x33a   : > { %v2488_v28 = vpop.eup %2487 }
 0x33b   : > { %v874_v31 = vmul.f32 %v2488_v28, %v860_v7 }
 0x33d   : > { %v882_v34 = vmul.f32 %v2079_v29, %v874_v31 }
 0x33e   : > { %v2490_v36 = vpop.eup %2489 }
 0x33f   : > { %v2492_v38 = vpop.eup %2491  ;;  %v890_v39 = vadd.f32 %v2080_v33, %v882_v34  ;;  %v915_v42 = vmul.f32 %v2490_v36, %v908_v8 }
 0x340   : > { %v875_v43 = vmul.f32 %v2492_v38, %v861_v12 }
 0x341   : > { %v916_v44 = vmul.f32 %v2079_v29, %v915_v42  ;;  %v897_v47 = vmul.f32 %v896_v40, %v890_v39 }
 0x342   : > { %v883_v46 = vmul.f32 %v2079_v29, %v875_v43 }
 0x343   : > { %v917_v49 = vadd.f32 %v2080_v33, %v916_v44  ;;  %v903_v54 = vadd.f32 %v902_v48, %v897_v47 }
 0x344   : > { %v891_v51 = vadd.f32 %v2080_v33, %v883_v46 }
 0x345   : > { %v922_v52 = vmul.f32 %v921_v45, %v917_v49 }
 0x346   : > { %v898_v53 = vmul.f32 %v896_v40, %v891_v51 }
 0x347   : > { %v927_v55 = vadd.f32 %v926_v50, %v922_v52 }
 0x348   : > { %v904_v56 = vadd.f32 %v902_v48, %v898_v53 }
 0x349   : > { %v2141_v57 = vpack.c.bf16 %v903_v54, %v927_v55 }
 0x34a   : > { %v2136_v58 = vpack.c.bf16 %v904_v56, %v904_v56 }
 0x34b   : > { %2142 = vst [vmem:[#allocation2] sm:$0xff] %v2141_v57  }
 0x34c   : > { %939 = vst [vmem:[#allocation2 + $0x8] sm:$0xf] %v2136_v58 }
 0x34d PF: > { %v2493_v59 = vld [vmem:[%s3859_s12] sm:$0xff]   ;;  %v2495_v61 = vld [vmem:[%s3859_s12 + $0x8] sm:$0xff]   ;;  %v2497_v63 = vld [vmem:[%s3859_s12 + $0x10] sm:$0xff]   ;;  %vm1294_vm0 = vcmask 261120   ;;  %vm1479_vm1 = vcmask 195584   ;;  %vm1523_vm2 = vcmask 1043456  }
 0x34e   : > { %v2494_v60 = vld [vmem:[%s3853_s6] sm:$0xff]   ;;  %2205 = vmatprep.subr.bf16.mxu1 %v2493_v59  ;;  %v2496_v62 = vld [vmem:[%s3853_s6 + $0x8] sm:$0xff]   ;;  %v2498_v0 = vld [vmem:[%s3853_s6 + $0x10] sm:$0xff]   ;;  %s4249_s29 = sld [smem:[#allocation45_spill]] }
 0x34f   : > { %2206 = vmatpush3.bf16.msra.mxu1 %v2493_v59  ;;  %2185 = vmatprep.subr.bf16.mxu0 %v2494_v60  ;;  %v2499_v1 = vld [vmem:[%s3859_s12 + $0x18] sm:$0xff]   ;;  %v2501_v3 = vld [vmem:[%s3859_s12 + $0x20] sm:$0xff]   ;;  %v2503_v5 = vld [vmem:[%s3859_s12 + $0x28] sm:$0xff]  }
 0x350   : > { %2186 = vmatpush3.bf16.msra.mxu0 %v2494_v60  ;;  %2207 = vmatprep.subr.bf16.mxu1 %v2495_v61  ;;  %v2500_v2 = vld [vmem:[%s3853_s6 + $0x18] sm:$0xff]   ;;  %v2502_v4 = vld [vmem:[%s3853_s6 + $0x20] sm:$0xff]   ;;  %v2504_v7 = vld [vmem:[%s3853_s6 + $0x28] sm:$0xff]  }
 0x351   : > { %2187 = vmatprep.subr.bf16.mxu0 %v2496_v62  ;;  %v2505_v8 = vld [vmem:[%s3859_s12 + $0x30] sm:$0xff]   ;;  %v2507_v10 = vld [vmem:[%s3859_s12 + $0x38] sm:$0xff]  }
 0x352   : > { %v2509_v6 = vld [vmem:[#allocation2] sm:$0xff]   ;;  %v2506_v9 = vld [vmem:[%s3853_s6 + $0x30] sm:$0xff]  }
 0x353   : > { %2208 = vmatpush3.bf16.msra.mxu1 %v2495_v61  ;;  %2221 = vmatprep.mubr.bf16.mxu1 %v2509_v6  ;;  %v2508_v11 = vld [vmem:[%s3853_s6 + $0x38] sm:$0xff]   ;;  %v3926_v12 = vld [vmem:[#allocation2 + $0x8] ss:$0 sps:$4 sm:$0xff]  }
 0x354   : > { %2188 = vmatpush3.bf16.msra.mxu0 %v2496_v62  ;;  %2209 = vmatprep.subr.bf16.mxu1 %v2497_v63  ;;  %p2121_p4 = scmp.ne.s32.totalorder %s4249_s29, 3 }
 0x355   : > { %2189 = vmatprep.subr.bf16.mxu0 %v2498_v0  ;;  %2201 = vmatprep.mubr.bf16.mxu0 %v2509_v6 }
 0x357   : > { %2210 = vmatpush3.bf16.msra.mxu1 %v2497_v63 }
 0x358   : > { %2190 = vmatpush3.bf16.msra.mxu0 %v2498_v0  ;;  %2211 = vmatprep.subr.bf16.mxu1 %v2499_v1 }
 0x359   : > { %2191 = vmatprep.subr.bf16.mxu0 %v2500_v2 }
 0x35b   : > { %2212 = vmatpush3.bf16.msra.mxu1 %v2499_v1 }
 0x35c   : > { %2192 = vmatpush3.bf16.msra.mxu0 %v2500_v2  ;;  %2213 = vmatprep.subr.bf16.mxu1 %v2501_v3 }
 0x35d   : > { %2193 = vmatprep.subr.bf16.mxu0 %v2502_v4 }
 0x35f   : > { %2214 = vmatpush3.bf16.msra.mxu1 %v2501_v3 }
 0x360   : > { %2194 = vmatpush3.bf16.msra.mxu0 %v2502_v4  ;;  %2215 = vmatprep.subr.bf16.mxu1 %v2503_v5 }
 0x361   : > { %2195 = vmatprep.subr.bf16.mxu0 %v2504_v7 }
 0x363   : > { %2216 = vmatpush3.bf16.msra.mxu1 %v2503_v5 }
 0x364   : > { %2196 = vmatpush3.bf16.msra.mxu0 %v2504_v7  ;;  %2217 = vmatprep.subr.bf16.mxu1 %v2505_v8 }
 0x365   : > { %2197 = vmatprep.subr.bf16.mxu0 %v2506_v9 }
 0x367   : > { %2218 = vmatpush3.bf16.msra.mxu1 %v2505_v8 }
 0x368   : > { %2198 = vmatpush3.bf16.msra.mxu0 %v2506_v9  ;;  %2219 = vmatprep.subr.bf16.mxu1 %v2507_v10 }
 0x369   : > { %2199 = vmatprep.subr.bf16.mxu0 %v2508_v11 }
 0x36b   : > { %2220 = vmatpush3.bf16.msra.mxu1 %v2507_v10 }
 0x36c   : > { %2200 = vmatpush3.bf16.msra.mxu0 %v2508_v11 }
 0x36e   : > { %2222 = vmatmul.mubr.bf16.vlgmr.msra.gmra.mrb[0].mxu1 %v3926_v12 }
 0x36f   : > { %2202 = vmatmul.mubr.bf16.vlgmr.msra.gmra.mrb[0].mxu0 %v3926_v12 }
 0x370   : > { %2241 = vmatprep.mubr.bf16.mxu0 %v2509_v6 }
 0x441   : > { %v2223_v13 = vpop.f32.mrb[0].mxu1 }
 0x442   : > { %v1166_v14 = vpop.f32.mrb[1].mxu1  ;;  %v1361_v15 = vsel %vm1294_vm0, %v2223_v13, 0.0  ;;  %v2203_v16 = vpop.f32.mrb[0].mxu0 }
 0x443   : > { %1362 = vadd.xlane.f32.xlu1 %v1361_v15  ;;  %v2224_v17 = vpop.f32.mrb[2].mxu1  ;;  %v1355_v18 = vsel %vm1294_vm0, %v1166_v14, 0.0  ;;  %v1054_v19 = vpop.f32.mrb[1].mxu0  ;;  %v1301_v25 = vsel %vm1294_vm0, %v2203_v16, 0.0 }
 0x444   : > { %1356 = vadd.xlane.f32.xlu0 %v1355_v18  ;;  %v1169_v20 = vpop.f32.mrb[3].mxu1  ;;  %v1295_v21 = vsel %vm1294_vm0, %v1054_v19, 0.0  ;;  %v2204_v22 = vpop.f32.mrb[2].mxu0 }
 0x445   : > { %v1057_v23 = vpop.f32.mrb[3].mxu0  ;;  %v1358_v24 = vsel %vm1294_vm0, %v1169_v20, 0.0 }
 0x446   : > { %v1298_v26 = vsel %vm1294_vm0, %v1057_v23, 0.0 }
 0x447   : > { %1296 = vadd.xlane.f32.xlu1 %v1295_v21 }
 0x448   : > { %1359 = vadd.xlane.f32.xlu0 %v1358_v24  ;;  %v2109_v24 = vld [vmem:[#allocation16] ss:$0 sm:$0xff] }
 0x44b   : > { %1302 = vadd.xlane.f32.xlu1 %v1301_v25 }
 0x44c   : > { %1299 = vadd.xlane.f32.xlu0 %v1298_v26 }
 0x4d0   : > { %v1363_v27 = vpop.xlane.xlu1 %1362 }
 0x4d1   : > { %v1366_v28 = vmul.f32 0.03125, %v1363_v27  ;;  %v1357_v29 = vpop.xlane.xlu0 %1356 }
 0x4d2   : > { %v1364_v30 = vmul.f32 0.03125, %v1357_v29 }
 0x4d3   : > { %v3936_v31 = vsub.f32 %v2223_v13, %v1366_v28 }
 0x4d4   : > { %v1367_v32 = vsub.f32 %v1166_v14, %v1364_v30  ;;  %v1297_v33 = vpop.xlane.xlu1 %1296  ;;  %v2111_v14 = vld [vmem:[#allocation19] ss:$0 sm:$0xff] }
 0x4d5   : > { %v1305_v34 = vmul.f32 0.03125, %v1297_v33  ;;  %v1360_v35 = vpop.xlane.xlu0 %1359  ;;  %v1372_v38 = vmul.f32 %v3936_v31, %v3936_v31 }
 0x4d6   : > { %v1365_v36 = vmul.f32 0.03125, %v1360_v35  ;;  %v1370_v37 = vmul.f32 %v1367_v32, %v1367_v32 }
 0x4d7   : > { %v1308_v39 = vsub.f32 %v1054_v19, %v1305_v34  ;;  %v1379_v47 = vsel %vm1294_vm0, %v1372_v38, 0.0  ;;  %v2112_v19 = vld [vmem:[#allocation20] ss:$0 sm:$0xff] }
 0x4d8   : > { %v1368_v40 = vsub.f32 %v1169_v20, %v1365_v36  ;;  %v1303_v41 = vpop.xlane.xlu1 %1302  ;;  %v1373_v42 = vsel %vm1294_vm0, %v1370_v37, 0.0 }
 0x4d9   : > { %v1307_v43 = vmul.f32 0.03125, %v1303_v41  ;;  %1374 = vadd.xlane.f32.xlu0 %v1373_v42  ;;  %v1300_v44 = vpop.xlane.xlu0 %1299  ;;  %v1311_v51 = vmul.f32 %v1308_v39, %v1308_v39 }
 0x4da   : > { %v1306_v45 = vmul.f32 0.03125, %v1300_v44  ;;  %v1371_v46 = vmul.f32 %v1368_v40, %v1368_v40 }
 0x4db   : > { %v3942_v48 = vsub.f32 %v2203_v16, %v1307_v43  ;;  %v1314_v53 = vsel %vm1294_vm0, %v1311_v51, 0.0  ;;  %v2516_v51 = vld [vmem:[%s3867_s8 + $0x28] sm:$0xff]  }
 0x4dc   : > { %v1309_v49 = vsub.f32 %v1057_v23, %v1306_v45  ;;  %v1376_v50 = vsel %vm1294_vm0, %v1371_v46, 0.0  ;;  %v2511_v46 = vld [vmem:[%s3867_s8] sm:$0xff]  }
 0x4dd   : > { %1377 = vadd.xlane.f32.xlu1 %v1376_v50  ;;  %1380 = vadd.xlane.f32.xlu0 %v1379_v47  ;;  %v1313_v55 = vmul.f32 %v3942_v48, %v3942_v48  ;;  %v2512_v47 = vld [vmem:[%s3867_s8 + $0x8] sm:$0xff]   ;;  %v2515_v50 = vld [vmem:[%s3867_s8 + $0x20] sm:$0xff]  }
 0x4de   : > { %v1312_v52 = vmul.f32 %v1309_v49, %v1309_v49  ;;  %2225 = vmatprep.subr.bf16.mxu0 %v2511_v46 }
 0x4df   : > { %v1320_v56 = vsel %vm1294_vm0, %v1313_v55, 0.0  ;;  %2226 = vmatpush3.bf16.msra.mxu0 %v2511_v46  ;;  %v1576_v46 = vld [vmem:[#allocation3 + $0x8] sm:$0xff] }
 0x4e0   : > { %v1317_v54 = vsel %vm1294_vm0, %v1312_v52, 0.0  ;;  %2227 = vmatprep.subr.bf16.mxu0 %v2512_v47  ;;  %v2517_v52 = vld [vmem:[%s3867_s8 + $0x30] sm:$0xff]  }
 0x4e1   : > { %1315 = vadd.xlane.f32.xlu1 %v1314_v53  ;;  %1318 = vadd.xlane.f32.xlu0 %v1317_v54  ;;  %v2518_v53 = vld [vmem:[%s3867_s8 + $0x38] sm:$0xff]  }
 0x4e3   : > { %2228 = vmatpush3.bf16.msra.mxu0 %v2512_v47 }
 0x4e5   : > { %1321 = vadd.xlane.f32.xlu1 %v1320_v56 }
 0x566   : > { %v1375_v57 = vpop.xlane.xlu0 %1374 }
 0x567   : > { %v1382_v58 = vmul.f32 0.03125, %v1375_v57 }
 0x569   : > { %v1385_v59 = vadd.f32 1e-06, %v1382_v58 }
 0x56a   : > { %v1378_v60 = vpop.xlane.xlu1 %1377  ;;  %v1381_v61 = vpop.xlane.xlu0 %1380 }
 0x56b   : > { %2521 = vrsqrt.f32 %v1385_v59  ;;  %v1383_v62 = vmul.f32 0.03125, %v1378_v60  ;;  %v1384_v63 = vmul.f32 0.03125, %v1381_v61 }
 0x56d   : > { %v1386_v0 = vadd.f32 1e-06, %v1383_v62  ;;  %v1387_v1 = vadd.f32 1e-06, %v1384_v63 }
 0x56e   : > { %v1316_v2 = vpop.xlane.xlu1 %1315  ;;  %v1319_v3 = vpop.xlane.xlu0 %1318 }
 0x56f   : > { %2523 = vrsqrt.f32 %v1386_v0  ;;  %v1323_v4 = vmul.f32 0.03125, %v1316_v2  ;;  %v1324_v5 = vmul.f32 0.03125, %v1319_v3 }
 0x570   : > { %2525 = vrsqrt.f32 %v1387_v1 }
 0x571   : > { %v1326_v6 = vadd.f32 1e-06, %v1323_v4  ;;  %v1327_v7 = vadd.f32 1e-06, %v1324_v5 }
 0x572   : > { %v1322_v8 = vpop.xlane.xlu1 %1321 }
 0x573   : > { %2527 = vrsqrt.f32 %v1326_v6  ;;  %v1325_v9 = vmul.f32 0.03125, %v1322_v8 }
 0x574   : > { %2529 = vrsqrt.f32 %v1327_v7 }
 0x575   : > { %v2522_v10 = vpop.eup %2521  ;;  %v1328_v11 = vadd.f32 1e-06, %v1325_v9 }
 0x576   : > { %v1391_v13 = vmul.f32 %v2522_v10, %v1367_v32  ;;  %v2110_v32 = vld [vmem:[#allocation17] ss:$0 sm:$0xff] }
 0x577   : > { %2531 = vrsqrt.f32 %v1328_v11 }
 0x578   : > { %v1400_v18 = vmul.f32 %v2111_v14, %v1391_v13 }
 0x579   : > { %v2524_v15 = vpop.eup %2523 }
 0x57a   : > { %v2526_v16 = vpop.eup %2525  ;;  %v1392_v17 = vmul.f32 %v2524_v15, %v1368_v40  ;;  %v1409_v27 = vadd.f32 %v2112_v19, %v1400_v18 }
 0x57b   : > { %v1393_v20 = vmul.f32 %v2526_v16, %v3936_v31 }
 0x57c   : > { %v1401_v21 = vmul.f32 %v2111_v14, %v1392_v17 }
 0x57d   : > { %v2528_v22 = vpop.eup %2527  ;;  %v1402_v23 = vmul.f32 %v2111_v14, %v1393_v20 }
 0x57e   : > { %v2530_v25 = vpop.eup %2529  ;;  %v1332_v26 = vmul.f32 %v2528_v22, %v1308_v39  ;;  %v1410_v28 = vadd.f32 %v2112_v19, %v1401_v21  ;;  %v2519_v22 = vld [vmem:[%s756_s15] sm:$0xff]  }
 0x57f   : > { %v1333_v29 = vmul.f32 %v2530_v25, %v1309_v49  ;;  %v1411_v30 = vadd.f32 %v2112_v19, %v1402_v23  ;;  %v2514_v49 = vld [vmem:[%s3867_s8 + $0x18] sm:$0xff]  }
 0x580   : > { %v1414_v33 = vpack.c.bf16 %v1410_v28, %v1409_v27  ;;  %v1341_v34 = vmul.f32 %v2109_v24, %v1332_v26 }
 0x581   : > { %v2532_v35 = vpop.eup %2531  ;;  %v1342_v36 = vmul.f32 %v2109_v24, %v1333_v29  ;;  %v1415_v37 = vpack.c.bf16 %v1411_v30, %v1411_v30 }
 0x582   : > { %2269 = vmatprep.subr.msk.bf16.mxu1 %vm1294_vm0, %v1414_v33  ;;  %v1423_v31 = vsel %vm1294_vm0, %v1414_v33, 0  ;;  %v1350_v38 = vadd.f32 %v2110_v32, %v1341_v34  ;;  %v1334_v39 = vmul.f32 %v2532_v35, %v3942_v48  ;;  %v2513_v48 = vld [vmem:[%s3867_s8 + $0x10] sm:$0xff]  }
 0x583   : > { %2246 = vmatpush3.bf16.xpose.msra.mxu1 %v1423_v31  ;;  %v1351_v40 = vadd.f32 %v2110_v32, %v1342_v36  ;;  %v1426_v43 = vsel %vm1294_vm0, %v1415_v37, 0  ;;  %2229 = vmatprep.subr.bf16.mxu0 %v2513_v48  ;;  %v2520_v35 = vld [vmem:[%s756_s15 + $0x8] sm:$0xff]  }
 0x584   : > { %2270 = vmatprep.subr.msk.bf16.mxu1 %vm1294_vm0, %v1415_v37  ;;  %v1343_v42 = vmul.f32 %v2109_v24, %v1334_v39  ;;  %2230 = vmatpush3.bf16.msra.mxu0 %v2513_v48 }
 0x585   : > { %v1412_v41 = vpack.c.bf16 %v1351_v40, %v1350_v38  ;;  %2231 = vmatprep.subr.bf16.mxu0 %v2514_v49 }
 0x586   : > { %v1352_v44 = vadd.f32 %v2110_v32, %v1343_v42  ;;  %v1575_v42 = vld [vmem:[#allocation3] sm:$0xff] }
 0x587   : > { %2249 = vmatprep.mubr.msk.bf16.mxu1 %vm1294_vm0, %v1412_v41  ;;  %v1577_v41 = vld [vmem:[#allocation3 + $0x10] sm:$0xff] }
 0x588   : > { %v1413_v45 = vpack.c.bf16 %v1352_v44, %v1352_v44  ;;  %2232 = vmatpush3.bf16.msra.mxu0 %v2514_v49 }
 0x589   : > { %2233 = vmatprep.subr.bf16.mxu0 %v2515_v50 }
 0x58b   : > { %2248 = vmatpush3.bf16.xpose.msra.mxu1 %v1426_v43 }
 0x58c   : > { %2234 = vmatpush3.bf16.msra.mxu0 %v2515_v50 }
 0x58d   : > { %2235 = vmatprep.subr.bf16.mxu0 %v2516_v51 }
 0x590   : > { %2236 = vmatpush3.bf16.msra.mxu0 %v2516_v51 }
 0x591   : > { %2237 = vmatprep.subr.bf16.mxu0 %v2517_v52 }
 0x592   : > { %2250 = vmatmul.mubr.msk.bf16.vlgmr.msra.gmra.mrb[4].mxu1 %vm1294_vm0, %v1413_v45 }
 0x594   : > { %2238 = vmatpush3.bf16.msra.mxu0 %v2517_v52  ;;  %v2122_v52 = vld [vmem:[#allocation23] ss:$0 sm:$0xff] (!%p2121_p4) }
 0x595   : > { %2239 = vmatprep.subr.bf16.mxu0 %v2518_v53 }
 0x598   : > { %2240 = vmatpush3.bf16.msra.mxu0 %v2518_v53  ;;  %v1677_v53 = vlaneseq (!%p2121_p4) }
 0x59b   : > { %2242 = vmatmul.mubr.bf16.vlgmr.msra.gmra.mrb[4].mxu0 %v3926_v12 }
 0x665   : > { %v2251_v54 = vpop.f32.mrb[4].mxu1 }
 0x666   : > { %v1462_v55 = vpop.f32.mrb[5].mxu1  ;;  %v1478_v59 = vmul.f32 0.17677669, %v2251_v54 }
 0x667   : > { %v1476_v56 = vmul.f32 0.17677669, %v1462_v55  ;;  %v2252_v57 = vpop.f32.mrb[6].mxu1  ;;  %v1678_v55 = vshrl.u32 (!%p2121_p4), %v1677_v53, 7 }
 0x668   : > { %v1465_v58 = vpop.f32.mrb[7].mxu1  ;;  %v1486_v63 = vsel %vm1479_vm1, %v1478_v59, -inf  ;;  %v1660_v57 = vld [vmem:[%s704_s22] sm:$0x3f] (!%p2121_p4) }
 0x669   : > { %v1477_v60 = vmul.f32 0.17677669, %v1465_v58  ;;  %v1480_v61 = vsel %vm1479_vm1, %v1476_v56, -inf }
 0x66a   : > { %1481 = vmax.xlane.f32.xlu0 %v1480_v61 }
 0x66b   : > { %v1483_v62 = vsel %vm1479_vm1, %v1477_v60, -inf }
 0x66c   : > { %1484 = vmax.xlane.f32.xlu1 %v1483_v62  ;;  %v1689_v62 = vsub.s32 (!%p2121_p4), 5, %v1678_v55 }
 0x66e   : > { %1487 = vmax.xlane.f32.xlu0 %v1486_v63  ;;  %v2243_v0 = vpop.f32.mrb[4].mxu0 }
 0x66f   : > { %v1278_v1 = vpop.f32.mrb[5].mxu0  ;;  %v1516_v19 = vpack.c.bf16 %v2243_v0, %v2243_v0  ;;  %v1690_v0 = vrot.slane (!%p2121_p4), %v1660_v57, %v1689_v62 }
 0x670   : > { %v2244_v12 = vpop.f32.mrb[6].mxu0 }
 0x671   : > { %v1281_v18 = vpop.f32.mrb[7].mxu0  ;;  %v1525_v21 = vsel %vm1523_vm2, %v1516_v19, 0  ;;  %v1675_v12 = vld [vmem:[%s3821_s9 + $0x8] sm:$0xff] (!%p2121_p4) }
 0x672   : > { %v1515_v20 = vpack.c.bf16 %v1281_v18, %v1278_v1  ;;  %v1674_v1 = vld [vmem:[%s3821_s9] sm:$0xff] (!%p2121_p4) }
 0x674   : > { %2253 = vmatprep.subr.bf16.mxu1 %v1515_v20 }
 0x675   : > { %2254 = vmatpush3.bf16.msra.mxu1 %v1515_v20 }
 0x676   : > { %2271 = vmatprep.subr.msk.bf16.mxu1 %vm1523_vm2, %v1516_v19 }
 0x679   : > { %2256 = vmatpush3.bf16.msra.mxu1 %v1525_v21 }
 0x67a   : > { %2261 = vmatprep.subr.bf16.mxu1 %v2519_v22 }
 0x6f7   : > { %v1482_v2 = vpop.xlane.xlu0 %1481 }
 0x6f8   : > { %v1489_v3 = vsub.f32 %v1476_v56, %v1482_v2  ;;  %v1676_v2 = vld [vmem:[%s687_s25] sm:$0xff] (!%p2121_p4) }
 0x6f9   : > { %v1485_v4 = vpop.xlane.xlu1 %1484 }
 0x6fa   : > { %v1492_v5 = vmul.f32 1.442695, %v1489_v3  ;;  %v1490_v6 = vsub.f32 %v1477_v60, %v1485_v4 }
 0x6fb   : > { %v1488_v7 = vpop.xlane.xlu0 %1487 }
 0x6fc   : > { %2533 = vpow2.f32 %v1492_v5  ;;  %v1494_v8 = vmul.f32 1.442695, %v1490_v6  ;;  %v1491_v9 = vsub.f32 %v1478_v59, %v1488_v7  ;;  %v1679_v59 = vsub.s32 (!%p2121_p4), 2, %v1678_v55 }
 0x6fe   : > { %2535 = vpow2.f32 %v1494_v8  ;;  %v1496_v10 = vmul.f32 1.442695, %v1491_v9  ;;  %v1680_v63 = vrot.slane (!%p2121_p4), %v1660_v57, %v1679_v59 }
 0x700   : > { %2537 = vpow2.f32 %v1496_v10 }
 0x706   : > { %v2534_v11 = vpop.eup %2533 }
 0x707   : > { %v1498_v13 = vsel %vm1479_vm1, %v2534_v11, 0.0 }
 0x708   : > { %v2536_v14 = vpop.eup %2535  ;;  %1499 = vadd.xlane.f32.xlu1 %v1498_v13 }
 0x709   : > { %v1501_v15 = vsel %vm1479_vm1, %v2536_v14, 0.0 }
 0x70a   : > { %v2538_v16 = vpop.eup %2537  ;;  %1502 = vadd.xlane.f32.xlu0 %v1501_v15 }
 0x70b   : > { %v1504_v17 = vsel %vm1479_vm1, %v2538_v16, 0.0 }
 0x70c   : > { %1505 = vadd.xlane.f32.xlu1 %v1504_v17 }
 0x795   : > { %v1500_v23 = vpop.xlane.xlu1 %1499 }
 0x796   : > { %2539 = vrcp.f32 %v1500_v23 }
 0x797   : > { %v1503_v24 = vpop.xlane.xlu0 %1502 }
 0x798   : > { %2541 = vrcp.f32 %v1503_v24 }
 0x799   : > { %v1506_v25 = vpop.xlane.xlu1 %1505 }
 0x79a   : > { %2543 = vrcp.f32 %v1506_v25 }
 0x7a0   : > { %v2540_v26 = vpop.eup %2539 }
 0x7a1   : > { %v1510_v28 = vmul.f32 %v2540_v26, %v2534_v11 }
 0x7a2   : > { %v2542_v27 = vpop.eup %2541 }
 0x7a3   : > { %v1511_v29 = vmul.f32 %v2542_v27, %v2536_v14 }
 0x7a4   : > { %v2544_v30 = vpop.eup %2543 }
 0x7a5   : > { %v1512_v32 = vmul.f32 %v2544_v30, %v2538_v16  ;;  %v1513_v33 = vpack.c.bf16 %v1511_v29, %v1510_v28 }
 0x7a7   : > { %v1514_v34 = vpack.c.bf16 %v1512_v32, %v1512_v32  ;;  %2257 = vmatprep.mubr.msk.bf16.mxu1 %vm1479_vm1, %v1513_v33 }
 0x7a9   : > { %2258 = vmatmul.mubr.msk.bf16.vlgmr.msra.gmra.mrb[8].mxu1 %vm1479_vm1, %v1514_v34 }
 0x7aa   : > { %2262 = vmatpush3.bf16.msra.mxu1 %v2519_v22 }
 0x7ab   : > { %2263 = vmatprep.subr.bf16.mxu1 %v2520_v35 }
 0x7ae   : > { %2264 = vmatpush3.bf16.msra.mxu1 %v2520_v35 }
 0x87c   : > { %v2259_v36 = vpop.f32.mrb[8].mxu1 }
 0x87d   : > { %v1561_v31 = vpop.f32.mrb[9].mxu1  ;;  %v1579_v39 = vpack.c.bf16 %v2259_v36, %v2259_v36 }
 0x87e   : > { %v2260_v37 = vpop.f32.mrb[10].mxu1 }
 0x87f   : > { %v1564_v38 = vpop.f32.mrb[11].mxu1 }
 0x880   : > { %v1578_v40 = vpack.c.bf16 %v1564_v38, %v1561_v31 }
 0x882   : > { %2265 = vmatprep.mubr.msk.bf16.mxu1 %vm1294_vm0, %v1578_v40 }
 0x883   : > { %2266 = vmatmul.mubr.msk.bf16.vlgmr.msra.gmra.mrb[12].mxu1 %vm1294_vm0, %v1579_v39 }
 0x956   : > { %v2267_v43 = vpop.f32.mrb[12].mxu1  ;;  %1659 = sbr.rel (%p2121_p4) target bundleno = 2411 (0x96b), region = 140 }
 0x957   : > { %v1652_v44 = vadd.f32 %v2267_v43, %v1577_v41  ;;  %v1636_v45 = vpop.f32.mrb[13].mxu1 }
 0x958   : > { %v1650_v47 = vadd.f32 %v1636_v45, %v1575_v42  ;;  %v2268_v48 = vpop.f32.mrb[14].mxu1 }
 0x959   : > { %1655 = vst [vmem:[#allocation3 + $0x10] sm:$0xff] %v1652_v44  ;;  %v1639_v49 = vpop.f32.mrb[15].mxu1 }
 0x95a   : > { %1653 = vst [vmem:[#allocation3] sm:$0xff] %v1650_v47  ;;  %v1651_v50 = vadd.f32 %v1639_v49, %v1576_v46 }
 0x95c   : > { %1654 = vst [vmem:[#allocation3 + $0x8] sm:$0xff] %v1651_v50 }
 0x960   : > { %v1663_v54 = vld [vmem:[#allocation3 + $0x10] sm:$0xff] }
 0x961   : > { %v1661_v56 = vld [vmem:[#allocation3] sm:$0xff]  ;;  %v1673_v60 = vadd.f32 %v2122_v52, %v1663_v54 }
 0x962   : > { %v1671_v61 = vadd.f32 %v2122_v52, %v1661_v56 }
 0x963   : > { %v1662_v51 = vld [vmem:[#allocation3 + $0x8] sm:$0xff]  ;;  %v1682_v4 = vmul.f32 %v1680_v63, %v1673_v60 }
 0x964   : > { %v1672_v58 = vadd.f32 %v2122_v52, %v1662_v51  ;;  %v1691_v5 = vmul.f32 %v1690_v0, %v1671_v61 }
 0x965   : > { %v1684_v7 = vadd.f32 %v1682_v4, %v1675_v12 }
 0x966   : > { %v1681_v3 = vmul.f32 %v1680_v63, %v1672_v58  ;;  %v1692_v8 = vadd.f32 %v1691_v5, %v1676_v2 }
 0x967   : > { %1686 = vst [vmem:[%s3900_s21 + $0x8] sm:$0xff] %v1684_v7 }
 0x968   : > { %v1683_v6 = vadd.f32 %v1681_v3, %v1674_v1  ;;  %1693 = vst [vmem:[%s841_s24] sm:$0xff] %v1692_v8 }
 0x96a   : > { %1685 = vst [vmem:[%s3900_s21] sm:$0xff] %v1683_v6 }
 0x96b PF: > { %s4250_s18 = sld [smem:[#allocation46_spill]]  ;;  %s4251_s3 = sld [smem:[#allocation50_spill]] }
 0x96c   : > { %s4252_s22 = sld [smem:[#allocation69_spill]]  ;;  %s1713_s16 = sshll.u32 %s3900_s21, 4  ;;  %s3999_s16 = int_to_ptr.vmem [resolvable:$true] %s1713_s16 }
 0x96d   : > { %s1695_s6 = scalar_lea.sflag [#allocation6], %s3814_s5  ;;  %s2951_s12 = scalar_lea.vmem %s3999_s16, 256 }
 0x96e   : > { %p2952_p13 = scmp.ne.s32.totalorder %s3999_s16, %s2951_s12  ;;  %s3174_s8 = smov [#allocation24]  }
 0x96f   : > { %s2955_s27 = sshll.u32 %s3174_s8, 4  ;;  %s2956_s27 = int_to_ptr.vmem [resolvable:$false] %s2955_s27 }
 0x970   : > { %s2957_s15 = scalar_lea.vmem %s2956_s27, 512  ;;  %p2958_p7 = scmp.lt.s32.totalorder %s3999_s16, %s2956_s27 }
 0x971   : > { %s2137_s30 = sshll.u32 %s4250_s18, 8  ;;  %p4254_p3 = scmp.ne.s32.totalorder %s4251_s3, 0 }
 0x972   : > { %s4253_s7 = smov %s4252_s22  ;;  %s3996_s25 = scalar_lea.hbm %s4252_s22, %s2137_s30 }
 0x973   : > { %p2953_p1 = pnand %p2952_p13, %p4254_p3  ;;  %p2959_p12 = scmp.lt.s32.totalorder %s2957_s15, %s2951_s12 }
 0x975   : > { %p2954_p5 = pneg %p2953_p1  ;;  %p2960_p8 = por %p2959_p12, %p2958_p7 }
 0x977   : > { %p2961_p0 = pnand %p2960_p8, %p2954_p5 }
 0x979   : > { %2964 = shalt.err (!%p2961_p0)
}
 0x97a   : > { %s2965_s21 = scalar_lea.hbm %s3996_s25, 256  ;;  %s2969_s30 = scalar_lea.hbm %s4253_s7, 512 }
 0x97b   : > { %p2966_p9 = scmp.ne.s32.totalorder %s3996_s25, %s2965_s21  ;;  %p2970_p2 = scmp.lt.u32.totalorder %s3996_s25, %s4253_s7 }
 0x97c   : > { %p2971_p6 = scmp.lt.u32.totalorder %s2969_s30, %s2965_s21  ;;  %p2973_p13 = scmp.lt.u32.totalorder %s2965_s21, %s3996_s25 }
 0x97d   : > { %p2967_p10 = pnand %p2966_p9, %p4254_p3 }
 0x97e   : > { %p2972_p4 = por %p2971_p6, %p2970_p2 }
 0x97f   : > { %p2968_p11 = pneg %p2967_p10 }
 0x980   : > { %p2974_p1 = por %p2973_p13, %p2972_p4 }
 0x982   : > { %p2975_p5 = pnand %p2974_p1, %p2968_p11 }
 0x984   : > { %2978 = shalt.err (!%p2975_p5)
}
 0x985   : > { %s3175_s22 = smov 128   ;;  %s3176_s12 = smov 8  }
 0x986   : > { %2314 = dma.vmem_to_hbm [thread:$0]  (%p4254_p3), %s3999_s16, 256, %s3996_s25, %s1695_s6, %s3175_s22, %s3175_s22, %s3176_s12  }
 0x987   : > { %s2127_s8 = sshll.u32 %s4250_s18, 7  ;;  %s1729_s27 = sshll.u32 %s841_s24, 4  ;;  %s1730_s27 = int_to_ptr.vmem [resolvable:$true] %s1729_s27 }
 0x988   : > { %s4255_s2 = sld [smem:[#allocation70_spill]]  ;;  %s1700_s30 = scalar_lea.sflag [#allocation26], %s3814_s5 }
 0x989   : > { %s2979_s23 = scalar_lea.vmem %s1730_s27, 128  ;;  %s3177_s9 = smov [#allocation25]  }
 0x98a   : > { %p2980_p7 = scmp.ne.s32.totalorder %s1730_s27, %s2979_s23  ;;  %s2983_s0 = sshll.u32 %s3177_s9, 4  ;;  %s2984_s0 = int_to_ptr.vmem [resolvable:$false] %s2983_s0 }
 0x98b   : > { %s2985_s1 = scalar_lea.vmem %s2984_s0, 256  ;;  %p2986_p0 = scmp.lt.s32.totalorder %s1730_s27, %s2984_s0 }
 0x98c   : > { %p2981_p12 = pnand %p2980_p7, %p4254_p3  ;;  %p2987_p9 = scmp.lt.s32.totalorder %s2985_s1, %s2979_s23 }
 0x98e   : > { %s4031_s29 = scalar_lea.hbm %s4255_s2, %s2127_s8  ;;  %p2982_p8 = pneg %p2981_p12 }
 0x98f   : > { %p2988_p10 = por %p2987_p9, %p2986_p0 }
 0x991   : > { %p2989_p11 = pnand %p2988_p10, %p2982_p8 }
 0x993   : > { %2992 = shalt.err (!%p2989_p11)
}
 0x994   : > { %s2993_s5 = scalar_lea.hbm %s4031_s29, 128  ;;  %s2997_s18 = scalar_lea.hbm %s4255_s2, 256 }
 0x995   : > { %p2994_p2 = scmp.ne.s32.totalorder %s4031_s29, %s2993_s5  ;;  %p2998_p13 = scmp.lt.u32.totalorder %s4031_s29, %s4255_s2 }
 0x996   : > { %p2999_p1 = scmp.lt.u32.totalorder %s2997_s18, %s2993_s5  ;;  %p3001_p7 = scmp.lt.u32.totalorder %s2993_s5, %s4031_s29 }
 0x997   : > { %p2995_p6 = pnand %p2994_p2, %p4254_p3 }
 0x998   : > { %p3000_p5 = por %p2999_p1, %p2998_p13 }
 0x999   : > { %p2996_p4 = pneg %p2995_p6 }
 0x99a   : > { %p3002_p12 = por %p3001_p7, %p3000_p5 }
 0x99c   : > { %p3003_p8 = pnand %p3002_p12, %p2996_p4 }
 0x99e   : > { %3006 = shalt.err (!%p3003_p8)
}
 0x99f   : > { %2315 = dma.vmem_to_hbm [thread:$0]  (%p4254_p3), %s1730_s27, 128, %s4031_s29, %s1700_s30  }
 0x9a0 PF: > { %s4256_s1 = sld [smem:[#allocation42_spill]]  ;;  %s4257_s16 = sld [smem:[#allocation51_spill]] }
 0x9a1   : > { %p2384_p0 = scmp.ge.s32.totalorder %s3153_s28, 2 }
 0x9a6   : > { %s1741_s6 = sand.u32 1, %s4256_s1   ;;  %p4258_p9 = scmp.ne.s32.totalorder %s4257_s16, 0 }
 0x9a7   : > { %s1742_s22 = scalar_lea.sflag [#allocation6], %s1741_s6 }
 0x9a8   : > { %p2363_p10 = pnand %p2384_p0, %p4258_p9 }
 0x9aa   : > { %3104 = dma.done.wait (!%p2363_p10), %s1742_s22, 256  }
 0x9ab   : > { %3106 = vsyncadd (!%p2363_p10), %s1742_s22, 4294967040  ;;  %s1751_s12 = scalar_lea.sflag [#allocation26], %s1741_s6 }
 0x9ac   : > { %3108 = dma.done.wait (!%p2363_p10), %s1751_s12, 128  }
 0x9ad   : > { %3110 = vsyncadd (!%p2363_p10), %s1751_s12, 4294967168  ;;  %s41_s28 = sadd.s32 1, %s3153_s28   ;;  %s4259_s21 = sld [smem:[#allocation43_spill]] }
 0x9ae   : > { %p38_p11 = scmp.ge.s32.totalorder %s41_s28, 10   ;;  %s4260_s22 = sld [smem:[#allocation44_spill]] }
 0x9af   : > { %s4261_s23 = sld [smem:[#allocation54_spill]]  ;;  %s4262_s25 = sld [smem:[#allocation47_spill]] }
 0x9b0   : > { %s4263_s3 = sld [smem:[#allocation52_spill]]  ;;  %s4264_s27 = sld [smem:[#allocation53_spill]] }
 0x9b1   : > { %s4265_s18 = smov %s3117_s19  ;;  %s4266_s19 = smov %s3121_s20 }
 0x9b2   : > { %s4267_s20 = smov %s3583_s11  ;;  %s4268_s24 = smov %s3145_s26 }
 0x9b3   :  { %40 = sbr.rel (!%p38_p11) target bundleno = 33 (0x21), region = 242 }
 0x9b6   : > { %s4269_s26 = smov %s4263_s3 }
 0x9ba   :  { %1756 = vsyncpa [#allocation5], 1 }
 0x9bb   :  { %1758 = vsyncpa [#allocation5 + $0x1], 1 }
 0x9bc   :  { %1759 = vsyncpa [#allocation8], 1 }
 0x9bd   :  { %1761 = vsyncpa [#allocation8 + $0x1], 1 }
 0x9be   :  { %1762 = vsyncpa [#allocation11], 1 }
 0x9bf   :  { %1763 = vsyncpa [#allocation18], 1 }
 0x9c0   :  { %1764 = vsyncpa [#allocation21], 1 }
 0x9c1   :  { %1765 = vsyncpa [#allocation6], 1 }
 0x9c2   :  { %1767 = vsyncpa [#allocation6 + $0x1], 1 }
 0x9c3   :  { %1768 = vsyncpa [#allocation26], 1 }
 0x9c4   :  { %1770 = vsyncpa [#allocation26 + $0x1], 1 }

</bundles_post_ra>
